<compile_context>
chip_gen: v7x
topology: tpu7x:2x2x1
jax: 0.10.0
libtpu: 0.0.40
codegen_flags: <defaults>
</compile_context>

<pallas_src>
from functools import partial

import jax
import jax.numpy as jnp
from jax.experimental import pallas as pl
from jax.experimental.pallas import tpu as pltpu

_LANE = 128
_NEG = -1e30  # masks padded tag lanes out of the log_softmax


def _round_up(x, m):
    return (x + m - 1) // m * m


def lstm_tagger_kernel(x_ref, wih_ref, whh_ref, b_ref, wtag_ref, btag_ref,
                       out_ref, *, gate_pad, seq_len):
    """Single-invocation kernel.

    x_ref    : (seq, Ep)       embedded sentence, feature dim zero-padded
    wih_ref  : (Ep, 4*GP)      W_ih^T, each gate block padded to GP lanes
    whh_ref  : (GP, 4*GP)      W_hh^T, padded rows/cols are zero
    b_ref    : (1, 4*GP)       b_ih + b_hh, padded lanes zero
    wtag_ref : (GP, TP)        hidden2tag weight^T, padded rows/cols zero
    btag_ref : (1, TP)         hidden2tag bias, padded lanes = -1e30
    out_ref  : (seq, TP)       lane-dense log-softmax tag scores
    """
    GP = gate_pad

    # Hoisted input projection + bias for ALL timesteps: one batched matmul.
    x_proj = (jnp.dot(x_ref[...], wih_ref[...],
                      preferred_element_type=jnp.float32)
              + b_ref[...])                                  # (seq, 4*GP)
    whh = whh_ref[...]                                       # (GP, 4*GP)

    h = jnp.zeros((1, GP), jnp.float32)
    c = jnp.zeros((1, GP), jnp.float32)
    hs = []
    # Fully unrolled recurrence: seq_len is static and small, keeps hidden
    # states register resident and gives the scheduler full visibility.
    for t in range(seq_len):
        gates = x_proj[t:t + 1, :] + jnp.dot(
            h, whh, preferred_element_type=jnp.float32)      # (1, 4*GP)
        # 128-lane-aligned gate slices (PyTorch gate order: i, f, g, o).
        i_g = jax.nn.sigmoid(gates[:, 0 * GP:1 * GP])
        f_g = jax.nn.sigmoid(gates[:, 1 * GP:2 * GP])
        g_g = jnp.tanh(gates[:, 2 * GP:3 * GP])
        o_g = jax.nn.sigmoid(gates[:, 3 * GP:4 * GP])
        c = f_g * c + i_g * g_g
        h = o_g * jnp.tanh(c)
        hs.append(h)

    hs_all = jnp.concatenate(hs, axis=0)                     # (seq, GP)
    logits = (jnp.dot(hs_all, wtag_ref[...],
                      preferred_element_type=jnp.float32)
              + btag_ref[...])                               # (seq, TP)

    # log_softmax over the lane axis; padded lanes carry -1e30 so they do not
    # contribute to the max or the sum.
    m = jnp.max(logits, axis=1, keepdims=True)
    shifted = logits - m
    lse = jnp.log(jnp.sum(jnp.exp(shifted), axis=1, keepdims=True))
    out_ref[...] = shifted - lse                             # lane-dense store


def _pad_gate_cols(w_t, hidden_dim, gate_pad):
    """(rows, 4H) -> (rows, 4*GP): pad each of the 4 gate blocks to GP lanes."""
    rows = w_t.shape[0]
    w3 = w_t.reshape(rows, 4, hidden_dim)
    w3 = jnp.pad(w3, ((0, 0), (0, 0), (0, gate_pad - hidden_dim)))
    return w3.reshape(rows, 4 * gate_pad)


def lstm_tagger_forward(indices, params):
    """Forward pass; embedding gather + weight padding are JAX glue."""
    emb = params["embedding"]            # (vocab, E)
    w_ih = params["w_ih"]                # (4H, E)
    w_hh = params["w_hh"]                # (4H, H)
    b_ih = params["b_ih"]                # (4H,)
    b_hh = params["b_hh"]                # (4H,)
    w_tag = params["w_tag"]              # (T, H)
    b_tag = params["b_tag"]              # (T,)

    E = w_ih.shape[1]
    H = w_hh.shape[1]
    T = w_tag.shape[0]

    GP = _round_up(H, _LANE)             # per-gate padded lane width
    EP = _round_up(E, _LANE)             # padded embedding / contraction dim
    TP = _round_up(T, _LANE)             # padded (lane-dense) tag dim

    # TODO(synk): for large vocab/seq, fuse the embedding gather into the
    # kernel via PrefetchScalarGridSpec + pl.Element row gather; at this size
    # a host-side gather is cheaper and simpler.
    embeds = emb[indices].astype(jnp.float32)                # (seq, E)
    seq_len = embeds.shape[0]

    x_pad = jnp.pad(embeds, ((0, 0), (0, EP - E)))           # (seq, EP)

    wih_t = _pad_gate_cols(w_ih.T.astype(jnp.float32), H, GP)        # (E, 4GP)
    wih_t = jnp.pad(wih_t, ((0, EP - E), (0, 0)))                    # (EP, 4GP)
    whh_t = _pad_gate_cols(w_hh.T.astype(jnp.float32), H, GP)        # (H, 4GP)
    whh_t = jnp.pad(whh_t, ((0, GP - H), (0, 0)))                    # (GP, 4GP)
    bias = _pad_gate_cols((b_ih + b_hh).astype(jnp.float32)
                          .reshape(1, 4 * H), H, GP)                 # (1, 4GP)
    wtag_t = jnp.pad(w_tag.T.astype(jnp.float32),
                     ((0, GP - H), (0, TP - T)))                     # (GP, TP)
    btag = jnp.full((1, TP), _NEG, jnp.float32)
    btag = btag.at[:, :T].set(b_tag.astype(jnp.float32))             # (1, TP)

    vmem = pl.BlockSpec(memory_space=pltpu.MemorySpace.VMEM)
    kernel = partial(lstm_tagger_kernel, gate_pad=GP, seq_len=seq_len)

    out_padded = pl.pallas_call(
        kernel,
        out_shape=jax.ShapeDtypeStruct((seq_len, TP), jnp.float32),
        in_specs=[vmem] * 6,
        out_specs=vmem,
    )(x_pad, wih_t, whh_t, bias, wtag_t, btag)

    return out_padded[:, :T]


def lstm_tagger_reference(indices, params):
    """Pure-JAX reference matching the PyTorch module semantics."""
    emb = params["embedding"]
    x = emb[indices].astype(jnp.float32)
    H = params["w_hh"].shape[1]
    w_ih, w_hh = params["w_ih"], params["w_hh"]
    b = params["b_ih"] + params["b_hh"]
    h = jnp.zeros((H,), jnp.float32)
    c = jnp.zeros((H,), jnp.float32)
    hs = []
    for t in range(x.shape[0]):
        gates = w_ih @ x[t] + w_hh @ h + b
        i = jax.nn.sigmoid(gates[0:H])
        f = jax.nn.sigmoid(gates[H:2 * H])
        g = jnp.tanh(gates[2 * H:3 * H])
        o = jax.nn.sigmoid(gates[3 * H:4 * H])
        c = f * c + i * g
        h = o * jnp.tanh(c)
        hs.append(h)
    hs = jnp.stack(hs)
    logits = hs @ params["w_tag"].T + params["b_tag"]
    return jax.nn.log_softmax(logits, axis=1)


def init_params(key, vocab_size, embedding_dim, hidden_dim, tagset_size):
    """Deterministic init mirroring the PyTorch module's parameter shapes."""
    keys = jax.random.split(key, 7)
    k_lstm = 1.0 / jnp.sqrt(hidden_dim)
    k_lin = 1.0 / jnp.sqrt(hidden_dim)
    u = lambda k, shape, a: jax.random.uniform(k, shape, jnp.float32, -a, a)
    return {
        "embedding": jax.random.normal(keys[0], (vocab_size, embedding_dim),
                                       jnp.float32),
        "w_ih": u(keys[1], (4 * hidden_dim, embedding_dim), k_lstm),
        "w_hh": u(keys[2], (4 * hidden_dim, hidden_dim), k_lstm),
        "b_ih": u(keys[3], (4 * hidden_dim,), k_lstm),
        "b_hh": u(keys[4], (4 * hidden_dim,), k_lstm),
        "w_tag": u(keys[5], (tagset_size, hidden_dim), k_lin),
        "b_tag": u(keys[6], (tagset_size,), k_lin),
    }


def prepare_sequence(seq, to_idx):
    return jnp.array([to_idx[w] for w in seq], dtype=jnp.int32)


if __name__ == "__main__":
    EMBEDDING_DIM = 6
    HIDDEN_DIM = 6
    tag2idx = {"DET": 0, "NN": 1, "V": 2}

    test_sentence = "The cheese loves the elephant".lower().split()
    word2idx = {}
    for w in test_sentence:
        if w not in word2idx:
            word2idx[w] = len(word2idx)

    inputs = prepare_sequence(test_sentence, word2idx)       # (5,) int32

    params = init_params(jax.random.PRNGKey(0), len(word2idx),
                         EMBEDDING_DIM, HIDDEN_DIM, len(tag2idx))

    tag_scores = lstm_tagger_forward(inputs, params)         # (5, 3) log-probs
    jax.block_until_ready(tag_scores)

    # sanity: shape, normalization, and agreement with a pure-JAX reference
    assert tag_scores.shape == (len(test_sentence), len(tag2idx))
    row_sums = jnp.exp(tag_scores).sum(axis=1)
    assert bool(jnp.all(jnp.abs(row_sums - 1.0) < 1e-4))

    ref = lstm_tagger_reference(inputs, params)
    assert bool(jnp.max(jnp.abs(tag_scores - ref)) < 1e-2)

    print("KERNEL_OK")
</pallas_src>

<mosaic_0001>
module attributes {stable_mosaic.version = 11 : i64} {
  func.func @lstm_tagger_kernel(%arg0: memref<5x128xf32, #tpu.memory_space<vmem>>, %arg1: memref<128x512xf32, #tpu.memory_space<vmem>>, %arg2: memref<128x512xf32, #tpu.memory_space<vmem>>, %arg3: memref<1x512xf32, #tpu.memory_space<vmem>>, %arg4: memref<128x128xf32, #tpu.memory_space<vmem>>, %arg5: memref<1x128xf32, #tpu.memory_space<vmem>>, %arg6: memref<5x128xf32, #tpu.memory_space<vmem>>) attributes {dimension_semantics = [], scalar_prefetch = 0 : i64, scratch_operands = 0 : i64, tpu.core_type = #tpu.core_type<tc>} {
    %c0 = arith.constant 0 : index
    %c0_0 = arith.constant 0 : index
    %0 = vector.load %arg0[%c0, %c0_0] : memref<5x128xf32, #tpu.memory_space<vmem>>, vector<5x128xf32>
    %c0_1 = arith.constant 0 : index
    %c0_2 = arith.constant 0 : index
    %1 = vector.load %arg1[%c0_1, %c0_2] : memref<128x512xf32, #tpu.memory_space<vmem>>, vector<128x512xf32>
    %cst = arith.constant dense<0.000000e+00> : vector<5x512xf32>
    %2 = tpu.matmul %0, %1, %cst {dimension_numbers = #tpu.dot_dimension_numbers<[1], [0], [0], [1], [0, 0, 1, 1], [], []>} : vector<5x128xf32>, vector<128x512xf32>, vector<5x512xf32> -> vector<5x512xf32>
    %c0_3 = arith.constant 0 : index
    %c0_4 = arith.constant 0 : index
    %3 = vector.load %arg3[%c0_3, %c0_4] : memref<1x512xf32, #tpu.memory_space<vmem>>, vector<1x512xf32>
    %4 = vector.broadcast %3 : vector<1x512xf32> to vector<5x512xf32>
    %5 = arith.addf %2, %4 : vector<5x512xf32>
    %c0_5 = arith.constant 0 : index
    %c0_6 = arith.constant 0 : index
    %6 = vector.load %arg2[%c0_5, %c0_6] : memref<128x512xf32, #tpu.memory_space<vmem>>, vector<128x512xf32>
    %cst_7 = arith.constant 0.000000e+00 : f32
    %7 = vector.broadcast %cst_7 : f32 to vector<1x128xf32>
    %cst_8 = arith.constant 0.000000e+00 : f32
    %8 = vector.broadcast %cst_8 : f32 to vector<1x128xf32>
    %9 = vector.extract_strided_slice %5 {offsets = [0, 0], sizes = [1, 512], strides = [1, 1]} : vector<5x512xf32> to vector<1x512xf32>
    %cst_9 = arith.constant dense<0.000000e+00> : vector<1x512xf32>
    %10 = tpu.matmul %7, %6, %cst_9 {dimension_numbers = #tpu.dot_dimension_numbers<[1], [0], [0], [1], [0, 0, 1, 1], [], []>} : vector<1x128xf32>, vector<128x512xf32>, vector<1x512xf32> -> vector<1x512xf32>
    %11 = arith.addf %9, %10 : vector<1x512xf32>
    %12 = vector.extract_strided_slice %11 {offsets = [0, 0], sizes = [1, 128], strides = [1, 1]} : vector<1x512xf32> to vector<1x128xf32>
    %13 = arith.negf %12 : vector<1x128xf32>
    %14 = math.exp %13 : vector<1x128xf32>
    %cst_10 = arith.constant 1.000000e+00 : f32
    %15 = vector.broadcast %cst_10 : f32 to vector<1x128xf32>
    %16 = arith.addf %15, %14 : vector<1x128xf32>
    %17 = arith.divf %15, %16 : vector<1x128xf32>
    %18 = vector.extract_strided_slice %11 {offsets = [0, 128], sizes = [1, 128], strides = [1, 1]} : vector<1x512xf32> to vector<1x128xf32>
    %19 = arith.negf %18 : vector<1x128xf32>
    %20 = math.exp %19 : vector<1x128xf32>
    %cst_11 = arith.constant 1.000000e+00 : f32
    %21 = vector.broadcast %cst_11 : f32 to vector<1x128xf32>
    %22 = arith.addf %21, %20 : vector<1x128xf32>
    %23 = arith.divf %21, %22 : vector<1x128xf32>
    %24 = vector.extract_strided_slice %11 {offsets = [0, 256], sizes = [1, 128], strides = [1, 1]} : vector<1x512xf32> to vector<1x128xf32>
    %25 = math.tanh %24 : vector<1x128xf32>
    %26 = vector.extract_strided_slice %11 {offsets = [0, 384], sizes = [1, 128], strides = [1, 1]} : vector<1x512xf32> to vector<1x128xf32>
    %27 = arith.negf %26 : vector<1x128xf32>
    %28 = math.exp %27 : vector<1x128xf32>
    %cst_12 = arith.constant 1.000000e+00 : f32
    %29 = vector.broadcast %cst_12 : f32 to vector<1x128xf32>
    %30 = arith.addf %29, %28 : vector<1x128xf32>
    %31 = arith.divf %29, %30 : vector<1x128xf32>
    %32 = arith.mulf %23, %8 : vector<1x128xf32>
    %33 = arith.mulf %17, %25 : vector<1x128xf32>
    %34 = arith.addf %32, %33 : vector<1x128xf32>
    %35 = math.tanh %34 : vector<1x128xf32>
    %36 = arith.mulf %31, %35 : vector<1x128xf32>
    %37 = vector.extract_strided_slice %5 {offsets = [1, 0], sizes = [1, 512], strides = [1, 1]} : vector<5x512xf32> to vector<1x512xf32>
    %cst_13 = arith.constant dense<0.000000e+00> : vector<1x512xf32>
    %38 = tpu.matmul %36, %6, %cst_13 {dimension_numbers = #tpu.dot_dimension_numbers<[1], [0], [0], [1], [0, 0, 1, 1], [], []>} : vector<1x128xf32>, vector<128x512xf32>, vector<1x512xf32> -> vector<1x512xf32>
    %39 = arith.addf %37, %38 : vector<1x512xf32>
    %40 = vector.extract_strided_slice %39 {offsets = [0, 0], sizes = [1, 128], strides = [1, 1]} : vector<1x512xf32> to vector<1x128xf32>
    %41 = arith.negf %40 : vector<1x128xf32>
    %42 = math.exp %41 : vector<1x128xf32>
    %cst_14 = arith.constant 1.000000e+00 : f32
    %43 = vector.broadcast %cst_14 : f32 to vector<1x128xf32>
    %44 = arith.addf %43, %42 : vector<1x128xf32>
    %45 = arith.divf %43, %44 : vector<1x128xf32>
    %46 = vector.extract_strided_slice %39 {offsets = [0, 128], sizes = [1, 128], strides = [1, 1]} : vector<1x512xf32> to vector<1x128xf32>
    %47 = arith.negf %46 : vector<1x128xf32>
    %48 = math.exp %47 : vector<1x128xf32>
    %cst_15 = arith.constant 1.000000e+00 : f32
    %49 = vector.broadcast %cst_15 : f32 to vector<1x128xf32>
    %50 = arith.addf %49, %48 : vector<1x128xf32>
    %51 = arith.divf %49, %50 : vector<1x128xf32>
    %52 = vector.extract_strided_slice %39 {offsets = [0, 256], sizes = [1, 128], strides = [1, 1]} : vector<1x512xf32> to vector<1x128xf32>
    %53 = math.tanh %52 : vector<1x128xf32>
    %54 = vector.extract_strided_slice %39 {offsets = [0, 384], sizes = [1, 128], strides = [1, 1]} : vector<1x512xf32> to vector<1x128xf32>
    %55 = arith.negf %54 : vector<1x128xf32>
    %56 = math.exp %55 : vector<1x128xf32>
    %cst_16 = arith.constant 1.000000e+00 : f32
    %57 = vector.broadcast %cst_16 : f32 to vector<1x128xf32>
    %58 = arith.addf %57, %56 : vector<1x128xf32>
    %59 = arith.divf %57, %58 : vector<1x128xf32>
    %60 = arith.mulf %51, %34 : vector<1x128xf32>
    %61 = arith.mulf %45, %53 : vector<1x128xf32>
    %62 = arith.addf %60, %61 : vector<1x128xf32>
    %63 = math.tanh %62 : vector<1x128xf32>
    %64 = arith.mulf %59, %63 : vector<1x128xf32>
    %65 = vector.extract_strided_slice %5 {offsets = [2, 0], sizes = [1, 512], strides = [1, 1]} : vector<5x512xf32> to vector<1x512xf32>
    %cst_17 = arith.constant dense<0.000000e+00> : vector<1x512xf32>
    %66 = tpu.matmul %64, %6, %cst_17 {dimension_numbers = #tpu.dot_dimension_numbers<[1], [0], [0], [1], [0, 0, 1, 1], [], []>} : vector<1x128xf32>, vector<128x512xf32>, vector<1x512xf32> -> vector<1x512xf32>
    %67 = arith.addf %65, %66 : vector<1x512xf32>
    %68 = vector.extract_strided_slice %67 {offsets = [0, 0], sizes = [1, 128], strides = [1, 1]} : vector<1x512xf32> to vector<1x128xf32>
    %69 = arith.negf %68 : vector<1x128xf32>
    %70 = math.exp %69 : vector<1x128xf32>
    %cst_18 = arith.constant 1.000000e+00 : f32
    %71 = vector.broadcast %cst_18 : f32 to vector<1x128xf32>
    %72 = arith.addf %71, %70 : vector<1x128xf32>
    %73 = arith.divf %71, %72 : vector<1x128xf32>
    %74 = vector.extract_strided_slice %67 {offsets = [0, 128], sizes = [1, 128], strides = [1, 1]} : vector<1x512xf32> to vector<1x128xf32>
    %75 = arith.negf %74 : vector<1x128xf32>
    %76 = math.exp %75 : vector<1x128xf32>
    %cst_19 = arith.constant 1.000000e+00 : f32
    %77 = vector.broadcast %cst_19 : f32 to vector<1x128xf32>
    %78 = arith.addf %77, %76 : vector<1x128xf32>
    %79 = arith.divf %77, %78 : vector<1x128xf32>
    %80 = vector.extract_strided_slice %67 {offsets = [0, 256], sizes = [1, 128], strides = [1, 1]} : vector<1x512xf32> to vector<1x128xf32>
    %81 = math.tanh %80 : vector<1x128xf32>
    %82 = vector.extract_strided_slice %67 {offsets = [0, 384], sizes = [1, 128], strides = [1, 1]} : vector<1x512xf32> to vector<1x128xf32>
    %83 = arith.negf %82 : vector<1x128xf32>
    %84 = math.exp %83 : vector<1x128xf32>
    %cst_20 = arith.constant 1.000000e+00 : f32
    %85 = vector.broadcast %cst_20 : f32 to vector<1x128xf32>
    %86 = arith.addf %85, %84 : vector<1x128xf32>
    %87 = arith.divf %85, %86 : vector<1x128xf32>
    %88 = arith.mulf %79, %62 : vector<1x128xf32>
    %89 = arith.mulf %73, %81 : vector<1x128xf32>
    %90 = arith.addf %88, %89 : vector<1x128xf32>
    %91 = math.tanh %90 : vector<1x128xf32>
    %92 = arith.mulf %87, %91 : vector<1x128xf32>
    %93 = vector.extract_strided_slice %5 {offsets = [3, 0], sizes = [1, 512], strides = [1, 1]} : vector<5x512xf32> to vector<1x512xf32>
    %cst_21 = arith.constant dense<0.000000e+00> : vector<1x512xf32>
    %94 = tpu.matmul %92, %6, %cst_21 {dimension_numbers = #tpu.dot_dimension_numbers<[1], [0], [0], [1], [0, 0, 1, 1], [], []>} : vector<1x128xf32>, vector<128x512xf32>, vector<1x512xf32> -> vector<1x512xf32>
    %95 = arith.addf %93, %94 : vector<1x512xf32>
    %96 = vector.extract_strided_slice %95 {offsets = [0, 0], sizes = [1, 128], strides = [1, 1]} : vector<1x512xf32> to vector<1x128xf32>
    %97 = arith.negf %96 : vector<1x128xf32>
    %98 = math.exp %97 : vector<1x128xf32>
    %cst_22 = arith.constant 1.000000e+00 : f32
    %99 = vector.broadcast %cst_22 : f32 to vector<1x128xf32>
    %100 = arith.addf %99, %98 : vector<1x128xf32>
    %101 = arith.divf %99, %100 : vector<1x128xf32>
    %102 = vector.extract_strided_slice %95 {offsets = [0, 128], sizes = [1, 128], strides = [1, 1]} : vector<1x512xf32> to vector<1x128xf32>
    %103 = arith.negf %102 : vector<1x128xf32>
    %104 = math.exp %103 : vector<1x128xf32>
    %cst_23 = arith.constant 1.000000e+00 : f32
    %105 = vector.broadcast %cst_23 : f32 to vector<1x128xf32>
    %106 = arith.addf %105, %104 : vector<1x128xf32>
    %107 = arith.divf %105, %106 : vector<1x128xf32>
    %108 = vector.extract_strided_slice %95 {offsets = [0, 256], sizes = [1, 128], strides = [1, 1]} : vector<1x512xf32> to vector<1x128xf32>
    %109 = math.tanh %108 : vector<1x128xf32>
    %110 = vector.extract_strided_slice %95 {offsets = [0, 384], sizes = [1, 128], strides = [1, 1]} : vector<1x512xf32> to vector<1x128xf32>
    %111 = arith.negf %110 : vector<1x128xf32>
    %112 = math.exp %111 : vector<1x128xf32>
    %cst_24 = arith.constant 1.000000e+00 : f32
    %113 = vector.broadcast %cst_24 : f32 to vector<1x128xf32>
    %114 = arith.addf %113, %112 : vector<1x128xf32>
    %115 = arith.divf %113, %114 : vector<1x128xf32>
    %116 = arith.mulf %107, %90 : vector<1x128xf32>
    %117 = arith.mulf %101, %109 : vector<1x128xf32>
    %118 = arith.addf %116, %117 : vector<1x128xf32>
    %119 = math.tanh %118 : vector<1x128xf32>
    %120 = arith.mulf %115, %119 : vector<1x128xf32>
    %121 = vector.extract_strided_slice %5 {offsets = [4, 0], sizes = [1, 512], strides = [1, 1]} : vector<5x512xf32> to vector<1x512xf32>
    %cst_25 = arith.constant dense<0.000000e+00> : vector<1x512xf32>
    %122 = tpu.matmul %120, %6, %cst_25 {dimension_numbers = #tpu.dot_dimension_numbers<[1], [0], [0], [1], [0, 0, 1, 1], [], []>} : vector<1x128xf32>, vector<128x512xf32>, vector<1x512xf32> -> vector<1x512xf32>
    %123 = arith.addf %121, %122 : vector<1x512xf32>
    %124 = vector.extract_strided_slice %123 {offsets = [0, 0], sizes = [1, 128], strides = [1, 1]} : vector<1x512xf32> to vector<1x128xf32>
    %125 = arith.negf %124 : vector<1x128xf32>
    %126 = math.exp %125 : vector<1x128xf32>
    %cst_26 = arith.constant 1.000000e+00 : f32
    %127 = vector.broadcast %cst_26 : f32 to vector<1x128xf32>
    %128 = arith.addf %127, %126 : vector<1x128xf32>
    %129 = arith.divf %127, %128 : vector<1x128xf32>
    %130 = vector.extract_strided_slice %123 {offsets = [0, 128], sizes = [1, 128], strides = [1, 1]} : vector<1x512xf32> to vector<1x128xf32>
    %131 = arith.negf %130 : vector<1x128xf32>
    %132 = math.exp %131 : vector<1x128xf32>
    %cst_27 = arith.constant 1.000000e+00 : f32
    %133 = vector.broadcast %cst_27 : f32 to vector<1x128xf32>
    %134 = arith.addf %133, %132 : vector<1x128xf32>
    %135 = arith.divf %133, %134 : vector<1x128xf32>
    %136 = vector.extract_strided_slice %123 {offsets = [0, 256], sizes = [1, 128], strides = [1, 1]} : vector<1x512xf32> to vector<1x128xf32>
    %137 = math.tanh %136 : vector<1x128xf32>
    %138 = vector.extract_strided_slice %123 {offsets = [0, 384], sizes = [1, 128], strides = [1, 1]} : vector<1x512xf32> to vector<1x128xf32>
    %139 = arith.negf %138 : vector<1x128xf32>
    %140 = math.exp %139 : vector<1x128xf32>
    %cst_28 = arith.constant 1.000000e+00 : f32
    %141 = vector.broadcast %cst_28 : f32 to vector<1x128xf32>
    %142 = arith.addf %141, %140 : vector<1x128xf32>
    %143 = arith.divf %141, %142 : vector<1x128xf32>
    %144 = arith.mulf %135, %118 : vector<1x128xf32>
    %145 = arith.mulf %129, %137 : vector<1x128xf32>
    %146 = arith.addf %144, %145 : vector<1x128xf32>
    %147 = math.tanh %146 : vector<1x128xf32>
    %148 = arith.mulf %143, %147 : vector<1x128xf32>
    %149 = tpu.concatenate %36, %64, %92, %120, %148 in 0 : vector<1x128xf32>, vector<1x128xf32>, vector<1x128xf32>, vector<1x128xf32>, vector<1x128xf32> -> vector<5x128xf32>
    %c0_29 = arith.constant 0 : index
    %c0_30 = arith.constant 0 : index
    %150 = vector.load %arg4[%c0_29, %c0_30] : memref<128x128xf32, #tpu.memory_space<vmem>>, vector<128x128xf32>
    %cst_31 = arith.constant dense<0.000000e+00> : vector<5x128xf32>
    %151 = tpu.matmul %149, %150, %cst_31 {dimension_numbers = #tpu.dot_dimension_numbers<[1], [0], [0], [1], [0, 0, 1, 1], [], []>} : vector<5x128xf32>, vector<128x128xf32>, vector<5x128xf32> -> vector<5x128xf32>
    %c0_32 = arith.constant 0 : index
    %c0_33 = arith.constant 0 : index
    %152 = vector.load %arg5[%c0_32, %c0_33] : memref<1x128xf32, #tpu.memory_space<vmem>>, vector<1x128xf32>
    %153 = vector.broadcast %152 : vector<1x128xf32> to vector<5x128xf32>
    %154 = arith.addf %151, %153 : vector<5x128xf32>
    %cst_34 = arith.constant dense<0xFF800000> : vector<5xf32>
    %155 = vector.multi_reduction <maximumf>, %154, %cst_34 [1] : vector<5x128xf32> to vector<5xf32>
    %156 = vector.shape_cast %155 : vector<5xf32> to vector<5x1xf32>
    %157 = vector.broadcast %156 : vector<5x1xf32> to vector<5x128xf32>
    %158 = arith.subf %154, %157 : vector<5x128xf32>
    %159 = math.exp %158 : vector<5x128xf32>
    %cst_35 = arith.constant dense<0.000000e+00> : vector<5xf32>
    %160 = vector.multi_reduction <add>, %159, %cst_35 [1] : vector<5x128xf32> to vector<5xf32>
    %161 = vector.shape_cast %160 : vector<5xf32> to vector<5x1xf32>
    %162 = math.log %161 : vector<5x1xf32>
    %163 = vector.broadcast %162 : vector<5x1xf32> to vector<5x128xf32>
    %164 = arith.subf %158, %163 : vector<5x128xf32>
    %c0_36 = arith.constant 0 : index
    %c0_37 = arith.constant 0 : index
    %165 = vector.load %arg6[%c0_36, %c0_37] : memref<5x128xf32, #tpu.memory_space<vmem>>, vector<5x128xf32>
    tpu.vector_store %arg6[%c0_36, %c0_37], %164 {strides = array<i32>} : memref<5x128xf32, #tpu.memory_space<vmem>>, vector<5x128xf32>,
    return
  }
}

</mosaic_0001>

<bundles_post_ra>
// kernel: tpu_custom_call.1
= control target key start
LH: loop header
LB: loop body
LE: loop exit
PB: predicated region body
PF: predicated region fallthrough
CT: control target
= control target key end

     0   :  { %11 = vsyncpa [#allocation3], 0  ;;  %s2528_s0 = inlined_call_operand.hbm [shape: f32[5,128], index: 0, kind: input, shape index: {}]   ;;  %s2529_s1 = inlined_call_operand.hbm [shape: f32[128,512], index: 1, kind: input, shape index: {}]   ;;  %s2530_s2 = inlined_call_operand.hbm [shape: f32[128,512], index: 2, kind: input, shape index: {}]   ;;  %s2531_s3 = inlined_call_operand.vmem [shape: f32[1,512], index: 3, kind: input, shape index: {}]   ;;  %s2532_s4 = inlined_call_operand.hbm [shape: f32[128,128], index: 4, kind: input, shape index: {}]   ;;  %s2533_s5 = inlined_call_operand.vmem [shape: f32[1,128], index: 5, kind: input, shape index: {}]   ;;  %s2534_s6 = inlined_call_operand.hbm [shape: f32[5,128], index: 6, kind: output, shape index: {}]  }
   0x1   :  { %12 = vsyncpa [#allocation6], 0 }
   0x2   :  { %13 = vsyncpa [#allocation9], 0 }
   0x3   :  { %14 = vsyncpa [#allocation4], 0  ;;  %s2111_s21 = smov [#allocation5]   ;;  %s1993_s25 = scalar_lea.hbm %s2529_s1, 8192 }
   0x4   :  { %s30_s22 = sshll.u32 %s2111_s21, 4  ;;  %p1994_p0 = scmp.ne.s32.totalorder %s2529_s1, %s1993_s25  ;;  %s31_s22 = int_to_ptr.vmem [resolvable:$true] %s30_s22 }
   0x5   :  { %p1997_p1 = scmp.lt.u32.totalorder %s1993_s25, %s2529_s1 }
   0x7   :  { %p1999_p2 = pnand %p1997_p1, %p1994_p0 }
   0x9   :  { %2002 = shalt.err (!%p1999_p2)
}
   0xa   :  { %s2003_s30 = scalar_lea.vmem %s31_s22, 8192  ;;  %p2008_p4 = scmp.lt.s32.totalorder %s31_s22, %s31_s22 }
   0xb   :  { %p2004_p3 = scmp.ne.s32.totalorder %s31_s22, %s2003_s30  ;;  %p2009_p5 = scmp.lt.s32.totalorder %s2003_s30, %s2003_s30 }
   0xd   :  { %p2010_p6 = por %p2009_p5, %p2008_p4 }
   0xf   :  { %p2011_p7 = pnand %p2010_p6, %p2004_p3 }
  0x11   :  { %2014 = shalt.err (!%p2011_p7)
}
  0x12   :  { %s2112_s7 = smov 512   ;;  %s2113_s8 = smov 32  }
  0x13   :  { %36 = dma.hbm_to_vmem [thread:$0]  %s2529_s1, 8192, %s31_s22, [#allocation6], %s2112_s7, %s2112_s7, %s2113_s8  }
  0x14   :  { %s2114_s11 = smov [#allocation2]   ;;  %s2115_s13 = smov [#allocation7]  }
  0x15   :  { %s21_s12 = sshll.u32 %s2114_s11, 4  ;;  %s42_s14 = sshll.u32 %s2115_s13, 4  ;;  %s22_s12 = int_to_ptr.vmem [resolvable:$true] %s21_s12  ;;  %s43_s14 = int_to_ptr.vmem [resolvable:$true] %s42_s14 }
  0x16   :  { %s2015_s17 = scalar_lea.hbm %s2528_s0, 128 }
  0x17   :  { %p2016_p8 = scmp.ne.s32.totalorder %s2528_s0, %s2015_s17  ;;  %p2019_p9 = scmp.lt.u32.totalorder %s2015_s17, %s2528_s0 }
  0x19   :  { %p2021_p10 = pnand %p2019_p9, %p2016_p8 }
  0x1b   :  { %2024 = shalt.err (!%p2021_p10)
}
  0x1c   :  { %s2025_s1 = scalar_lea.vmem %s22_s12, 128  ;;  %p2030_p12 = scmp.lt.s32.totalorder %s22_s12, %s22_s12 }
  0x1d   :  { %p2026_p11 = scmp.ne.s32.totalorder %s22_s12, %s2025_s1  ;;  %p2031_p13 = scmp.lt.s32.totalorder %s2025_s1, %s2025_s1 }
  0x1f   :  { %p2032_p0 = por %p2031_p13, %p2030_p12 }
  0x21   :  { %p2033_p1 = pnand %p2032_p0, %p2026_p11 }
  0x23   :  { %2036 = shalt.err (!%p2033_p1)
}
  0x24   :  { %24 = dma.hbm_to_vmem [thread:$0]  %s2528_s0, 128, %s22_s12, [#allocation3]  }
  0x25   :  { %s2037_s26 = scalar_lea.hbm %s2530_s2, 8192 }
  0x26   :  { %p2038_p2 = scmp.ne.s32.totalorder %s2530_s2, %s2037_s26  ;;  %p2041_p3 = scmp.lt.u32.totalorder %s2037_s26, %s2530_s2 }
  0x28   :  { %p2043_p4 = pnand %p2041_p3, %p2038_p2 }
  0x2a   :  { %2046 = shalt.err (!%p2043_p4)
}
  0x2b   :  { %s2047_s9 = scalar_lea.vmem %s43_s14, 8192  ;;  %p2052_p6 = scmp.lt.s32.totalorder %s43_s14, %s43_s14 }
  0x2c   :  { %p2048_p5 = scmp.ne.s32.totalorder %s43_s14, %s2047_s9  ;;  %p2053_p7 = scmp.lt.s32.totalorder %s2047_s9, %s2047_s9 }
  0x2e   :  { %p2054_p8 = por %p2053_p7, %p2052_p6 }
  0x30   :  { %p2055_p9 = pnand %p2054_p8, %p2048_p5 }
  0x32   :  { %2058 = shalt.err (!%p2055_p9)
}
  0x33   :  { %48 = dma.hbm_to_vmem [thread:$0]  %s2530_s2, 8192, %s43_s14, [#allocation6], %s2112_s7, %s2112_s7, %s2113_s8  }
  0x34   :  { %s2116_s11 = smov [#allocation8]   ;;  %s2059_s16 = scalar_lea.hbm %s2532_s4, 2048 }
  0x35   :  { %s56_s12 = sshll.u32 %s2116_s11, 4  ;;  %p2060_p10 = scmp.ne.s32.totalorder %s2532_s4, %s2059_s16  ;;  %s57_s12 = int_to_ptr.vmem [resolvable:$true] %s56_s12 }
  0x36   :  { %p2063_p11 = scmp.lt.u32.totalorder %s2059_s16, %s2532_s4 }
  0x38   :  { %p2065_p12 = pnand %p2063_p11, %p2060_p10 }
  0x3a   :  { %2068 = shalt.err (!%p2065_p12)
}
  0x3b   :  { %s2069_s21 = scalar_lea.vmem %s57_s12, 2048  ;;  %p2074_p0 = scmp.lt.s32.totalorder %s57_s12, %s57_s12 }
  0x3c   :  { %p2070_p13 = scmp.ne.s32.totalorder %s57_s12, %s2069_s21  ;;  %p2075_p1 = scmp.lt.s32.totalorder %s2069_s21, %s2069_s21 }
  0x3e   :  { %p2076_p2 = por %p2075_p1, %p2074_p0 }
  0x40   :  { %p2077_p3 = pnand %p2076_p2, %p2070_p13 }
  0x42   :  { %2080 = shalt.err (!%p2077_p3)
}
  0x43   :  { %s2117_s2 = smov 128   ;;  %s2118_s7 = smov 8  }
  0x44   :  { %62 = dma.hbm_to_vmem [thread:$0]  %s2532_s4, 2048, %s57_s12, [#allocation9], %s2117_s2, %s2117_s2, %s2118_s7  }
  0x45   :  { %2103 = dma.done.wait [#allocation3], 128  }
  0x46   :  { %2104 = vsyncadd [#allocation3], 4294967168 }
  0x47   :  { %2105 = dma.done.wait [#allocation6], 16384  }
  0x48   :  { %2106 = vsyncadd [#allocation6], 4294950912 }
  0x49   :  { %2107 = dma.done.wait [#allocation9], 2048  }
  0x4a   :  { %2108 = vsyncadd [#allocation9], 4294965248  ;;  %v2119_v0 = vmov 0.0   ;;  %v79_v1 = vld [vmem:[#allocation5 + $0x8] sm:$0xff]  ;;  %v81_v3 = vld [vmem:[#allocation5 + $0x18] sm:$0xff]  ;;  %vm1289_vm0 = vcmask 1040384  }
  0x4b   :  { %228 = vmatprep.mubr.f32.mxu0 %v2119_v0  ;;  %299 = vmatprep.mubr.f32.mxu1 %v2119_v0  ;;  %v83_v2 = vld [vmem:[#allocation5 + $0x28] sm:$0xff]  ;;  %v85_v5 = vld [vmem:[#allocation5 + $0x38] sm:$0xff]  ;;  %v78_v6 = vld [vmem:[#allocation5] sm:$0xff]  ;;  %vm1291_vm1 = vcmask 1041408   ;;  %vm1293_vm2 = vcmask 1042432   ;;  %vm2121_vm3 = vmmov 0  }
  0x4c   :  { %v1489_v4 = vpack.c.bf16 %v83_v2, %v79_v1  ;;  %v82_v7 = vld [vmem:[#allocation5 + $0x20] sm:$0xff]  ;;  %v1521_v8 = vpack.c.bf16 %v85_v5, %v81_v3  ;;  %v80_v10 = vld [vmem:[#allocation5 + $0x10] sm:$0xff]  ;;  %v87_v12 = vld [vmem:[#allocation5 + $0x48] sm:$0xff]  ;;  %vm1295_vm4 = vcmask 1043456   ;;  %vm1390_vm5 = vcmask 1044480   ;;  %s2122_s23 = smov [#allocation10]  }
  0x4d   :  { %v1491_v9 = vpack.c.bf16 %v82_v7, %v78_v6  ;;  %v84_v11 = vld [vmem:[#allocation5 + $0x30] sm:$0xff]  ;;  %v91_v14 = vld [vmem:[#allocation5 + $0x68] sm:$0xff]  ;;  %v89_v15 = vld [vmem:[#allocation5 + $0x58] sm:$0xff]  ;;  %s1410_s24 = sshll.u32 %s2122_s23, 4  ;;  %s1411_s24 = int_to_ptr.vmem [resolvable:$true] %s1410_s24 }
  0x4e   :  { %1490 = vmatprep.subr.bf16.mxu0 %v1489_v4  ;;  %v1523_v13 = vpack.c.bf16 %v84_v11, %v80_v10  ;;  %v93_v16 = vld [vmem:[#allocation5 + $0x78] sm:$0xff]  ;;  %1522 = vmatprep.subr.bf16.mxu1 %v1521_v8  ;;  %v1493_v17 = vpack.c.bf16 %v91_v14, %v87_v12  ;;  %v86_v19 = vld [vmem:[#allocation5 + $0x40] sm:$0xff]  ;;  %v88_v21 = vld [vmem:[#allocation5 + $0x50] sm:$0xff]  ;;  %p2086_p5 = scmp.lt.s32.totalorder %s1411_s24, %s1411_s24 }
  0x4f   :  { %1492 = vmatpush1.bf16.msra.mxu0 %v1491_v9  ;;  %v1525_v18 = vpack.c.bf16 %v93_v16, %v89_v15  ;;  %v90_v20 = vld [vmem:[#allocation5 + $0x60] sm:$0xff]  ;;  %v92_v23 = vld [vmem:[#allocation5 + $0x70] sm:$0xff]  ;;  %v95_v24 = vld [vmem:[#allocation5 + $0x88] sm:$0xff] }
  0x50   :  { %1524 = vmatpush1.bf16.msra.mxu1 %v1523_v13  ;;  %v1495_v22 = vpack.c.bf16 %v90_v20, %v86_v19  ;;  %v99_v25 = vld [vmem:[#allocation5 + $0xa8] sm:$0xff]  ;;  %1494 = vmatprep.subr.bf16.mxu0 %v1493_v17  ;;  %v1527_v26 = vpack.c.bf16 %v92_v23, %v88_v21  ;;  %v97_v28 = vld [vmem:[#allocation5 + $0x98] sm:$0xff]  ;;  %v94_v30 = vld [vmem:[#allocation5 + $0x80] sm:$0xff] }
  0x51   :  { %1526 = vmatprep.subr.bf16.mxu1 %v1525_v18  ;;  %v1497_v27 = vpack.c.bf16 %v99_v25, %v95_v24  ;;  %v101_v29 = vld [vmem:[#allocation5 + $0xb8] sm:$0xff]  ;;  %v98_v32 = vld [vmem:[#allocation5 + $0xa0] sm:$0xff]  ;;  %v96_v33 = vld [vmem:[#allocation5 + $0x90] sm:$0xff] }
  0x52   :  { %v1529_v31 = vpack.c.bf16 %v101_v29, %v97_v28  ;;  %v100_v34 = vld [vmem:[#allocation5 + $0xb0] sm:$0xff]  ;;  %v1499_v35 = vpack.c.bf16 %v98_v32, %v94_v30  ;;  %v103_v36 = vld [vmem:[#allocation5 + $0xc8] sm:$0xff]  ;;  %v105_v38 = vld [vmem:[#allocation5 + $0xd8] sm:$0xff] }
  0x53   :  { %1496 = vmatpush1.bf16.msra.mxu0 %v1495_v22  ;;  %v107_v37 = vld [vmem:[#allocation5 + $0xe8] sm:$0xff]  ;;  %v1531_v39 = vpack.c.bf16 %v100_v34, %v96_v33  ;;  %v109_v41 = vld [vmem:[#allocation5 + $0xf8] sm:$0xff]  ;;  %v102_v42 = vld [vmem:[#allocation5 + $0xc0] sm:$0xff] }
  0x54   :  { %1528 = vmatpush1.bf16.msra.mxu1 %v1527_v26  ;;  %1498 = vmatprep.subr.bf16.mxu0 %v1497_v27  ;;  %v1501_v40 = vpack.c.bf16 %v107_v37, %v103_v36  ;;  %v106_v43 = vld [vmem:[#allocation5 + $0xe0] sm:$0xff]  ;;  %v1533_v44 = vpack.c.bf16 %v109_v41, %v105_v38  ;;  %v104_v45 = vld [vmem:[#allocation5 + $0xd0] sm:$0xff]  ;;  %v111_v47 = vld [vmem:[#allocation5 + $0x108] sm:$0xff] }
  0x55   :  { %1530 = vmatprep.subr.bf16.mxu1 %v1529_v31  ;;  %v108_v46 = vld [vmem:[#allocation5 + $0xf0] sm:$0xff]  ;;  %v115_v48 = vld [vmem:[#allocation5 + $0x128] sm:$0xff]  ;;  %v113_v49 = vld [vmem:[#allocation5 + $0x118] sm:$0xff]  ;;  %v1503_v51 = vpack.c.bf16 %v106_v43, %v102_v42 }
  0x56   :  { %v117_v50 = vld [vmem:[#allocation5 + $0x138] sm:$0xff]  ;;  %v1535_v52 = vpack.c.bf16 %v108_v46, %v104_v45  ;;  %v1505_v53 = vpack.c.bf16 %v115_v48, %v111_v47  ;;  %v110_v54 = vld [vmem:[#allocation5 + $0x100] sm:$0xff]  ;;  %v112_v56 = vld [vmem:[#allocation5 + $0x110] sm:$0xff] }
  0x57   :  { %1500 = vmatpush1.bf16.msra.mxu0 %v1499_v35  ;;  %v114_v55 = vld [vmem:[#allocation5 + $0x120] sm:$0xff]  ;;  %v1537_v57 = vpack.c.bf16 %v117_v50, %v113_v49  ;;  %v116_v58 = vld [vmem:[#allocation5 + $0x130] sm:$0xff]  ;;  %v119_v59 = vld [vmem:[#allocation5 + $0x148] sm:$0xff] }
  0x58   :  { %1532 = vmatpush1.bf16.msra.mxu1 %v1531_v39  ;;  %1502 = vmatprep.subr.bf16.mxu0 %v1501_v40  ;;  %v123_v60 = vld [vmem:[#allocation5 + $0x168] sm:$0xff]  ;;  %v121_v61 = vld [vmem:[#allocation5 + $0x158] sm:$0xff]  ;;  %v1507_v63 = vpack.c.bf16 %v114_v55, %v110_v54  ;;  %v1539_v1 = vpack.c.bf16 %v116_v58, %v112_v56  ;;  %v118_v3 = vld [vmem:[#allocation5 + $0x140] sm:$0xff] }
  0x59   :  { %1534 = vmatprep.subr.bf16.mxu1 %v1533_v44  ;;  %v125_v62 = vld [vmem:[#allocation5 + $0x178] sm:$0xff]  ;;  %v1509_v2 = vpack.c.bf16 %v123_v60, %v119_v59  ;;  %v122_v4 = vld [vmem:[#allocation5 + $0x160] sm:$0xff]  ;;  %v120_v5 = vld [vmem:[#allocation5 + $0x150] sm:$0xff] }
  0x5a   :  { %v1541_v6 = vpack.c.bf16 %v125_v62, %v121_v61  ;;  %v124_v7 = vld [vmem:[#allocation5 + $0x170] sm:$0xff]  ;;  %v127_v8 = vld [vmem:[#allocation5 + $0x188] sm:$0xff]  ;;  %v129_v10 = vld [vmem:[#allocation5 + $0x198] sm:$0xff]  ;;  %v1511_v12 = vpack.c.bf16 %v122_v4, %v118_v3 }
  0x5b   :  { %1504 = vmatpush1.bf16.msra.mxu0 %v1503_v51  ;;  %v131_v9 = vld [vmem:[#allocation5 + $0x1a8] sm:$0xff]  ;;  %v133_v11 = vld [vmem:[#allocation5 + $0x1b8] sm:$0xff]  ;;  %v1543_v13 = vpack.c.bf16 %v124_v7, %v120_v5  ;;  %v126_v15 = vld [vmem:[#allocation5 + $0x180] sm:$0xff] }
  0x5c   :  { %1536 = vmatpush1.bf16.msra.mxu1 %v1535_v52  ;;  %1506 = vmatprep.subr.bf16.mxu0 %v1505_v53  ;;  %v1513_v14 = vpack.c.bf16 %v131_v9, %v127_v8  ;;  %v130_v16 = vld [vmem:[#allocation5 + $0x1a0] sm:$0xff]  ;;  %v128_v17 = vld [vmem:[#allocation5 + $0x190] sm:$0xff]  ;;  %v1545_v18 = vpack.c.bf16 %v133_v11, %v129_v10  ;;  %v135_v20 = vld [vmem:[#allocation5 + $0x1c8] sm:$0xff] }
  0x5d   :  { %1538 = vmatprep.subr.bf16.mxu1 %v1537_v57  ;;  %v132_v19 = vld [vmem:[#allocation5 + $0x1b0] sm:$0xff]  ;;  %v139_v21 = vld [vmem:[#allocation5 + $0x1e8] sm:$0xff]  ;;  %v137_v22 = vld [vmem:[#allocation5 + $0x1d8] sm:$0xff]  ;;  %v1515_v24 = vpack.c.bf16 %v130_v16, %v126_v15 }
  0x5e   :  { %v141_v23 = vld [vmem:[#allocation5 + $0x1f8] sm:$0xff]  ;;  %v1547_v25 = vpack.c.bf16 %v132_v19, %v128_v17  ;;  %v1517_v26 = vpack.c.bf16 %v139_v21, %v135_v20  ;;  %v134_v27 = vld [vmem:[#allocation5 + $0x1c0] sm:$0xff]  ;;  %v136_v29 = vld [vmem:[#allocation5 + $0x1d0] sm:$0xff] }
  0x5f   :  { %1508 = vmatpush1.bf16.msra.mxu0 %v1507_v63  ;;  %v138_v28 = vld [vmem:[#allocation5 + $0x1e0] sm:$0xff]  ;;  %v1549_v30 = vpack.c.bf16 %v141_v23, %v137_v22  ;;  %v140_v31 = vld [vmem:[#allocation5 + $0x1f0] sm:$0xff]  ;;  %v307_v32 = vld [vmem:[#allocation7 + $0x8] sm:$0xff] }
  0x60   :  { %1540 = vmatpush1.bf16.msra.mxu1 %v1539_v1  ;;  %1510 = vmatprep.subr.bf16.mxu0 %v1509_v2  ;;  %v311_v33 = vld [vmem:[#allocation7 + $0x28] sm:$0xff]  ;;  %v309_v34 = vld [vmem:[#allocation7 + $0x18] sm:$0xff]  ;;  %v1519_v36 = vpack.c.bf16 %v138_v28, %v134_v27  ;;  %v1551_v37 = vpack.c.bf16 %v140_v31, %v136_v29  ;;  %v306_v39 = vld [vmem:[#allocation7] sm:$0xff] }
  0x61   :  { %1542 = vmatprep.subr.bf16.mxu1 %v1541_v6  ;;  %v313_v35 = vld [vmem:[#allocation7 + $0x38] sm:$0xff]  ;;  %v2214_v38 = vpack.c.bf16 %v311_v33, %v307_v32  ;;  %v310_v40 = vld [vmem:[#allocation7 + $0x20] sm:$0xff]  ;;  %v308_v41 = vld [vmem:[#allocation7 + $0x10] sm:$0xff] }
  0x62   :  { %v2216_v42 = vpack.c.bf16 %v313_v35, %v309_v34  ;;  %v312_v43 = vld [vmem:[#allocation7 + $0x30] sm:$0xff]  ;;  %v315_v44 = vld [vmem:[#allocation7 + $0x48] sm:$0xff]  ;;  %v317_v46 = vld [vmem:[#allocation7 + $0x58] sm:$0xff]  ;;  %v2218_v49 = vpack.c.bf16 %v310_v40, %v306_v39 }
  0x63   :  { %1512 = vmatpush1.bf16.msra.mxu0 %v1511_v12  ;;  %v319_v45 = vld [vmem:[#allocation7 + $0x68] sm:$0xff]  ;;  %v321_v47 = vld [vmem:[#allocation7 + $0x78] sm:$0xff]  ;;  %v2221_v50 = vpack.c.bf16 %v312_v43, %v308_v41  ;;  %v314_v52 = vld [vmem:[#allocation7 + $0x40] sm:$0xff] }
  0x64   :  { %1544 = vmatpush1.bf16.msra.mxu1 %v1543_v13  ;;  %1514 = vmatprep.subr.bf16.mxu0 %v1513_v14  ;;  %v77_v48 = vld [vmem:[#allocation2] sm:$0x1f]  ;;  %v2223_v51 = vpack.c.bf16 %v319_v45, %v315_v44  ;;  %v318_v53 = vld [vmem:[#allocation7 + $0x60] sm:$0xff]  ;;  %v316_v54 = vld [vmem:[#allocation7 + $0x50] sm:$0xff]  ;;  %v2226_v55 = vpack.c.bf16 %v321_v47, %v317_v46 }
  0x65   :  { %1546 = vmatprep.subr.bf16.mxu1 %v1545_v18  ;;  %v320_v56 = vld [vmem:[#allocation7 + $0x70] sm:$0xff]  ;;  %v323_v57 = vld [vmem:[#allocation7 + $0x88] sm:$0xff]  ;;  %v325_v59 = vld [vmem:[#allocation7 + $0x98] sm:$0xff]  ;;  %v2229_v61 = vpack.c.bf16 %v318_v53, %v314_v52 }
  0x66   :  { %v327_v58 = vld [vmem:[#allocation7 + $0xa8] sm:$0xff]  ;;  %v329_v60 = vld [vmem:[#allocation7 + $0xb8] sm:$0xff]  ;;  %v2233_v62 = vpack.c.bf16 %v320_v56, %v316_v54  ;;  %v322_v1 = vld [vmem:[#allocation7 + $0x80] sm:$0xff] }
  0x67   :  { %1516 = vmatpush1.bf16.msra.mxu0 %v1515_v24  ;;  %v2235_v63 = vpack.c.bf16 %v327_v58, %v323_v57  ;;  %v326_v2 = vld [vmem:[#allocation7 + $0xa0] sm:$0xff]  ;;  %v324_v3 = vld [vmem:[#allocation7 + $0x90] sm:$0xff]  ;;  %v2238_v4 = vpack.c.bf16 %v329_v60, %v325_v59  ;;  %v331_v6 = vld [vmem:[#allocation7 + $0xc8] sm:$0xff] }
  0x68   :  { %1548 = vmatpush1.bf16.msra.mxu1 %v1547_v25  ;;  %1518 = vmatprep.subr.bf16.mxu0 %v1517_v26  ;;  %v328_v5 = vld [vmem:[#allocation7 + $0xb0] sm:$0xff]  ;;  %v335_v7 = vld [vmem:[#allocation7 + $0xe8] sm:$0xff]  ;;  %v333_v8 = vld [vmem:[#allocation7 + $0xd8] sm:$0xff]  ;;  %v2243_v10 = vpack.c.bf16 %v326_v2, %v322_v1 }
  0x69   :  { %1550 = vmatprep.subr.bf16.mxu1 %v1549_v30  ;;  %v337_v9 = vld [vmem:[#allocation7 + $0xf8] sm:$0xff]  ;;  %v2247_v11 = vpack.c.bf16 %v328_v5, %v324_v3  ;;  %v2249_v12 = vpack.c.bf16 %v335_v7, %v331_v6  ;;  %v330_v13 = vld [vmem:[#allocation7 + $0xc0] sm:$0xff]  ;;  %v332_v15 = vld [vmem:[#allocation7 + $0xd0] sm:$0xff] }
  0x6a   :  { %v334_v14 = vld [vmem:[#allocation7 + $0xe0] sm:$0xff]  ;;  %v2252_v16 = vpack.c.bf16 %v337_v9, %v333_v8  ;;  %v336_v17 = vld [vmem:[#allocation7 + $0xf0] sm:$0xff]  ;;  %v339_v18 = vld [vmem:[#allocation7 + $0x108] sm:$0xff] }
  0x6b   :  { %1520 = vmatpush1.bf16.msra.mxu0 %v1519_v36  ;;  %v343_v19 = vld [vmem:[#allocation7 + $0x128] sm:$0xff]  ;;  %v341_v20 = vld [vmem:[#allocation7 + $0x118] sm:$0xff]  ;;  %v2255_v22 = vpack.c.bf16 %v334_v14, %v330_v13  ;;  %v2259_v23 = vpack.c.bf16 %v336_v17, %v332_v15  ;;  %v338_v25 = vld [vmem:[#allocation7 + $0x100] sm:$0xff] }
  0x6c   :  { %1552 = vmatpush1.bf16.msra.mxu1 %v1551_v37  ;;  %1554 = vmatprep.subr.bf16.mxu0 %v2214_v38  ;;  %v345_v21 = vld [vmem:[#allocation7 + $0x138] sm:$0xff]  ;;  %v2261_v24 = vpack.c.bf16 %v343_v19, %v339_v18  ;;  %v342_v26 = vld [vmem:[#allocation7 + $0x120] sm:$0xff]  ;;  %v340_v27 = vld [vmem:[#allocation7 + $0x110] sm:$0xff] }
  0x6d   :  { %1586 = vmatprep.subr.bf16.mxu1 %v2216_v42  ;;  %v2264_v28 = vpack.c.bf16 %v345_v21, %v341_v20  ;;  %v344_v29 = vld [vmem:[#allocation7 + $0x130] sm:$0xff]  ;;  %v347_v30 = vld [vmem:[#allocation7 + $0x148] sm:$0xff]  ;;  %v349_v32 = vld [vmem:[#allocation7 + $0x158] sm:$0xff]  ;;  %v2267_v34 = vpack.c.bf16 %v342_v26, %v338_v25  ;;  %v144_v26 = vlaneseq }
  0x6e   :  { %229 = vmatmul.mubr.f32.vlgmr.msra.gmra.mrb[0].mxu0 %v77_v48  ;;  %v351_v31 = vld [vmem:[#allocation7 + $0x168] sm:$0xff]  ;;  %v353_v33 = vld [vmem:[#allocation7 + $0x178] sm:$0xff]  ;;  %v2271_v35 = vpack.c.bf16 %v344_v29, %v340_v27  ;;  %v346_v37 = vld [vmem:[#allocation7 + $0x140] sm:$0xff] }
  0x6f   :  { %300 = vmatmul.mubr.f32.vlgmr.msra.gmra.mrb[0].mxu1 %v77_v48  ;;  %1556 = vmatpush1.bf16.msra.mxu0 %v2218_v49  ;;  %v2273_v36 = vpack.c.bf16 %v351_v31, %v347_v30  ;;  %v350_v39 = vld [vmem:[#allocation7 + $0x160] sm:$0xff]  ;;  %v348_v40 = vld [vmem:[#allocation7 + $0x150] sm:$0xff]  ;;  %v2276_v41 = vpack.c.bf16 %v353_v33, %v349_v32  ;;  %v355_v44 = vld [vmem:[#allocation7 + $0x188] sm:$0xff]  ;;  %v145_v27 = vshrl.u32 %v144_v26, 7 }
  0x70   :  { %1588 = vmatpush1.bf16.msra.mxu1 %v2221_v50  ;;  %1558 = vmatprep.subr.bf16.mxu0 %v2223_v51  ;;  %v352_v43 = vld [vmem:[#allocation7 + $0x170] sm:$0xff]  ;;  %v359_v45 = vld [vmem:[#allocation7 + $0x1a8] sm:$0xff]  ;;  %v357_v46 = vld [vmem:[#allocation7 + $0x198] sm:$0xff]  ;;  %v2279_v48 = vpack.c.bf16 %v350_v39, %v346_v37 }
  0x71   :  { %1590 = vmatprep.subr.bf16.mxu1 %v2226_v55  ;;  %434 = vmatprep.mubr.f32.mxu0 %v2119_v0  ;;  %v361_v47 = vld [vmem:[#allocation7 + $0x1b8] sm:$0xff]  ;;  %v2283_v52 = vpack.c.bf16 %v352_v43, %v348_v40  ;;  %v2285_v53 = vpack.c.bf16 %v359_v45, %v355_v44  ;;  %v354_v54 = vld [vmem:[#allocation7 + $0x180] sm:$0xff]  ;;  %v356_v57 = vld [vmem:[#allocation7 + $0x190] sm:$0xff]  ;;  %v146_v29 = vsub.s32 0, %v145_v27  ;;  %v150_v31 = vsub.s32 1, %v145_v27 }
  0x72   :  { %505 = vmatprep.mubr.f32.mxu1 %v2119_v0  ;;  %v358_v56 = vld [vmem:[#allocation7 + $0x1a0] sm:$0xff]  ;;  %v2288_v58 = vpack.c.bf16 %v361_v47, %v357_v46  ;;  %v360_v59 = vld [vmem:[#allocation7 + $0x1b0] sm:$0xff]  ;;  %v363_v60 = vld [vmem:[#allocation7 + $0x1c8] sm:$0xff]  ;;  %v158_v37 = vsub.s32 3, %v145_v27 }
  0x73   :  { %1560 = vmatpush1.bf16.msra.mxu0 %v2229_v61  ;;  %v367_v1 = vld [vmem:[#allocation7 + $0x1e8] sm:$0xff]  ;;  %v365_v2 = vld [vmem:[#allocation7 + $0x1d8] sm:$0xff]  ;;  %v2291_v5 = vpack.c.bf16 %v358_v56, %v354_v54  ;;  %v2295_v6 = vpack.c.bf16 %v360_v59, %v356_v57  ;;  %v362_v8 = vld [vmem:[#allocation7 + $0x1c0] sm:$0xff]  ;;  %v154_v57 = vsub.s32 2, %v145_v27 }
  0x74   :  { %1592 = vmatpush1.bf16.msra.mxu1 %v2233_v62  ;;  %1562 = vmatprep.subr.bf16.mxu0 %v2235_v63  ;;  %v369_v3 = vld [vmem:[#allocation7 + $0x1f8] sm:$0xff]  ;;  %v2297_v7 = vpack.c.bf16 %v367_v1, %v363_v60  ;;  %v366_v9 = vld [vmem:[#allocation7 + $0x1e0] sm:$0xff]  ;;  %v364_v14 = vld [vmem:[#allocation7 + $0x1d0] sm:$0xff] }
  0x75   :  { %1594 = vmatprep.subr.bf16.mxu1 %v2238_v4  ;;  %v2300_v13 = vpack.c.bf16 %v369_v3, %v365_v2  ;;  %v368_v15 = vld [vmem:[#allocation7 + $0x1f0] sm:$0xff]  ;;  %v2303_v17 = vpack.c.bf16 %v366_v9, %v362_v8  ;;  %v142_v30 = vld [vmem:[%s2531_s3] sm:$0xf] }
  0x76   :  { %v2307_v18 = vpack.c.bf16 %v368_v15, %v364_v14  ;;  %v147_v32 = vrot.slane %v142_v30, %v146_v29  ;;  %v151_v33 = vrot.slane %v142_v30, %v150_v31  ;;  %v159_v47 = vrot.slane %v142_v30, %v158_v37 }
  0x77   :  { %1564 = vmatpush1.bf16.msra.mxu0 %v2243_v10  ;;  %v155_v2 = vrot.slane %v142_v30, %v154_v57 }
  0x78   :  { %1596 = vmatpush1.bf16.msra.mxu1 %v2247_v11  ;;  %1566 = vmatprep.subr.bf16.mxu0 %v2249_v12 }
  0x79   :  { %1598 = vmatprep.subr.bf16.mxu1 %v2252_v16 }
  0x7b   :  { %1568 = vmatpush1.bf16.msra.mxu0 %v2255_v22 }
  0x7c   :  { %1600 = vmatpush1.bf16.msra.mxu1 %v2259_v23  ;;  %1570 = vmatprep.subr.bf16.mxu0 %v2261_v24 }
  0x7d   :  { %1602 = vmatprep.subr.bf16.mxu1 %v2264_v28 }
  0x7f   :  { %1572 = vmatpush1.bf16.msra.mxu0 %v2267_v34 }
  0x80   :  { %1604 = vmatpush1.bf16.msra.mxu1 %v2271_v35  ;;  %1574 = vmatprep.subr.bf16.mxu0 %v2273_v36 }
  0x81   :  { %1606 = vmatprep.subr.bf16.mxu1 %v2276_v41 }
  0x83   :  { %1576 = vmatpush1.bf16.msra.mxu0 %v2279_v48 }
  0x84   :  { %1608 = vmatpush1.bf16.msra.mxu1 %v2283_v52  ;;  %1578 = vmatprep.subr.bf16.mxu0 %v2285_v53 }
  0x85   :  { %1610 = vmatprep.subr.bf16.mxu1 %v2288_v58 }
  0x87   :  { %1580 = vmatpush1.bf16.msra.mxu0 %v2291_v5 }
  0x88   :  { %1612 = vmatpush1.bf16.msra.mxu1 %v2295_v6  ;;  %1582 = vmatprep.subr.bf16.mxu0 %v2297_v7 }
  0x89   :  { %1614 = vmatprep.subr.bf16.mxu1 %v2300_v13 }
  0x8b   :  { %1584 = vmatpush1.bf16.msra.mxu0 %v2303_v17 }
  0x8c   :  { %1616 = vmatpush1.bf16.msra.mxu1 %v2307_v18  ;;  %1618 = vmatprep.subr.bf16.mxu0 %v2214_v38 }
  0x8d   :  { %1650 = vmatprep.subr.bf16.mxu1 %v2216_v42 }
  0x8e   :  { %435 = vmatmul.mubr.f32.vlgmr.msra.gmra.mrb[2].mxu0 %v2119_v0 }
  0x8f   :  { %506 = vmatmul.mubr.f32.vlgmr.msra.gmra.mrb[2].mxu1 %v2119_v0  ;;  %1620 = vmatpush1.bf16.msra.mxu0 %v2218_v49 }
  0x90   :  { %1652 = vmatpush1.bf16.msra.mxu1 %v2221_v50  ;;  %1622 = vmatprep.subr.bf16.mxu0 %v2223_v51 }
  0x91   :  { %1654 = vmatprep.subr.bf16.mxu1 %v2226_v55  ;;  %604 = vmatprep.mubr.f32.mxu0 %v2119_v0 }
  0x92   :  { %675 = vmatprep.mubr.f32.mxu1 %v2119_v0 }
  0x93   :  { %1624 = vmatpush1.bf16.msra.mxu0 %v2229_v61 }
  0x94   :  { %1656 = vmatpush1.bf16.msra.mxu1 %v2233_v62  ;;  %1626 = vmatprep.subr.bf16.mxu0 %v2235_v63 }
  0x95   :  { %1658 = vmatprep.subr.bf16.mxu1 %v2238_v4 }
  0x97   :  { %1628 = vmatpush1.bf16.msra.mxu0 %v2243_v10 }
  0x98   :  { %1660 = vmatpush1.bf16.msra.mxu1 %v2247_v11  ;;  %1630 = vmatprep.subr.bf16.mxu0 %v2249_v12 }
  0x99   :  { %1662 = vmatprep.subr.bf16.mxu1 %v2252_v16 }
  0x9b   :  { %1632 = vmatpush1.bf16.msra.mxu0 %v2255_v22 }
  0x9c   :  { %1664 = vmatpush1.bf16.msra.mxu1 %v2259_v23  ;;  %1634 = vmatprep.subr.bf16.mxu0 %v2261_v24 }
  0x9d   :  { %1666 = vmatprep.subr.bf16.mxu1 %v2264_v28 }
  0x9f   :  { %1636 = vmatpush1.bf16.msra.mxu0 %v2267_v34 }
  0xa0   :  { %1668 = vmatpush1.bf16.msra.mxu1 %v2271_v35  ;;  %1638 = vmatprep.subr.bf16.mxu0 %v2273_v36 }
  0xa1   :  { %1670 = vmatprep.subr.bf16.mxu1 %v2276_v41 }
  0xa3   :  { %1640 = vmatpush1.bf16.msra.mxu0 %v2279_v48 }
  0xa4   :  { %1672 = vmatpush1.bf16.msra.mxu1 %v2283_v52  ;;  %1642 = vmatprep.subr.bf16.mxu0 %v2285_v53 }
  0xa5   :  { %1674 = vmatprep.subr.bf16.mxu1 %v2288_v58 }
  0xa7   :  { %1644 = vmatpush1.bf16.msra.mxu0 %v2291_v5 }
  0xa8   :  { %1676 = vmatpush1.bf16.msra.mxu1 %v2295_v6  ;;  %1646 = vmatprep.subr.bf16.mxu0 %v2297_v7 }
  0xa9   :  { %1678 = vmatprep.subr.bf16.mxu1 %v2300_v13 }
  0xab   :  { %1648 = vmatpush1.bf16.msra.mxu0 %v2303_v17 }
  0xac   :  { %1680 = vmatpush1.bf16.msra.mxu1 %v2307_v18  ;;  %1682 = vmatprep.subr.bf16.mxu0 %v2214_v38 }
  0xad   :  { %1714 = vmatprep.subr.bf16.mxu1 %v2216_v42 }
 0x141   :  { %v230_v19 = vpop.f32.mrb[0].mxu0 }
 0x142   :  { %v232_v20 = vpop.f32.mrb[1].mxu0  ;;  %v301_v21 = vpop.f32.mrb[0].mxu1  ;;  %v2353_v39 = vadd.f32 %v230_v19, %v147_v32 }
 0x143   :  { %v303_v25 = vpop.f32.mrb[1].mxu1  ;;  %v2355_v40 = vadd.f32 %v232_v20, %v151_v33  ;;  %v2362_v8 = vadd.f32 %v301_v21, %v155_v2 }
 0x144   :  { %v2359_v1 = vadd.f32 %v303_v25, %v159_v47 }
 0x161   :  { %v436_v43 = vpop.f32.mrb[2].mxu0 }
 0x162   :  { %v512_v44 = vadd.f32 %v436_v43, %v2353_v39  ;;  %v507_v45 = vpop.f32.mrb[2].mxu1  ;;  %v438_v46 = vpop.f32.mrb[3].mxu0 }
 0x163   :  { %v513_v54 = vadd.f32 %v438_v46, %v2355_v40  ;;  %v509_v56 = vpop.f32.mrb[3].mxu1  ;;  %v514_v14 = vadd.f32 %v507_v45, %v2362_v8 }
 0x164   :  { %v1421_v59 = vmul.f32 -1.442695, %v512_v44  ;;  %v515_v3 = vadd.f32 %v509_v56, %v2359_v1 }
 0x165   :  { %v1422_v60 = vmul.f32 -1.442695, %v513_v54 }
 0x166   :  { %1909 = vpow2.f32 %v1421_v59  ;;  %v1423_v9 = vmul.f32 -1.442695, %v515_v3 }
 0x167   :  { %1911 = vpow2.f32 %v1422_v60 }
 0x168   :  { %1913 = vpow2.f32 %v1423_v9 }
 0x169   :  { %1915 = vtanh.f32 %v514_v14 }
 0x170   :  { %v1910_v15 = vpop.eup %1909 }
 0x171   :  { %v1912_v19 = vpop.eup %1911  ;;  %v519_v20 = vadd.f32 1.0, %v1910_v15 }
 0x172   :  { %v525_v26 = vadd.f32 1.0, %v1912_v19  ;;  %v1914_v27 = vpop.eup %1913 }
 0x173   :  { %1917 = vrcp.f32 %v519_v20  ;;  %v1916_v25 = vpop.eup %1915  ;;  %v532_v32 = vadd.f32 1.0, %v1914_v27 }
 0x174   :  { %1919 = vrcp.f32 %v525_v26 }
 0x175   :  { %1921 = vrcp.f32 %v532_v32 }
 0x17d   :  { %v1918_v29 = vpop.eup %1917 }
 0x17e   :  { %v1920_v31 = vpop.eup %1919  ;;  %v536_v30 = vmul.f32 %v1918_v29, %v1916_v25 }
 0x17f   :  { %v535_v33 = vmul.f32 0.0, %v1920_v31  ;;  %v1922_v37 = vpop.eup %1921 }
 0x181   :  { %v2365_v21 = vadd.f32 %v536_v30, %v535_v33 }
 0x183   :  { %1923 = vtanh.f32 %v2365_v21  ;;  %v718_v33 = vrot.slane %v2365_v21, 7 }
 0x18d   :  { %v1924_v43 = vpop.eup %1923 }
 0x18e   :  { %v2368_v44 = vmul.f32 %v1924_v43, %v1922_v37 }
 0x190   :  { %605 = vmatmul.mubr.f32.vlgmr.msra.gmra.mrb[4].mxu0 %v2368_v44  ;;  %676 = vmatmul.mubr.f32.vlgmr.msra.gmra.mrb[4].mxu1 %v2368_v44 }
 0x191   :  { %1684 = vmatpush1.bf16.msra.mxu0 %v2218_v49  ;;  %1716 = vmatpush1.bf16.msra.mxu1 %v2221_v50 }
 0x192   :  { %1686 = vmatprep.subr.bf16.mxu0 %v2223_v51  ;;  %1718 = vmatprep.subr.bf16.mxu1 %v2226_v55 }
 0x193   :  { %792 = vmatprep.mubr.f32.mxu0 %v2119_v0  ;;  %863 = vmatprep.mubr.f32.mxu1 %v2119_v0 }
 0x195   :  { %1688 = vmatpush1.bf16.msra.mxu0 %v2229_v61  ;;  %1720 = vmatpush1.bf16.msra.mxu1 %v2233_v62 }
 0x196   :  { %1690 = vmatprep.subr.bf16.mxu0 %v2235_v63  ;;  %1722 = vmatprep.subr.bf16.mxu1 %v2238_v4 }
 0x199   :  { %1692 = vmatpush1.bf16.msra.mxu0 %v2243_v10  ;;  %1724 = vmatpush1.bf16.msra.mxu1 %v2247_v11 }
 0x19a   :  { %1694 = vmatprep.subr.bf16.mxu0 %v2249_v12  ;;  %1726 = vmatprep.subr.bf16.mxu1 %v2252_v16 }
 0x19d   :  { %1696 = vmatpush1.bf16.msra.mxu0 %v2255_v22  ;;  %1728 = vmatpush1.bf16.msra.mxu1 %v2259_v23 }
 0x19e   :  { %1698 = vmatprep.subr.bf16.mxu0 %v2261_v24  ;;  %1730 = vmatprep.subr.bf16.mxu1 %v2264_v28 }
 0x1a1   :  { %1700 = vmatpush1.bf16.msra.mxu0 %v2267_v34  ;;  %1732 = vmatpush1.bf16.msra.mxu1 %v2271_v35 }
 0x1a2   :  { %1702 = vmatprep.subr.bf16.mxu0 %v2273_v36  ;;  %1734 = vmatprep.subr.bf16.mxu1 %v2276_v41 }
 0x1a5   :  { %1704 = vmatpush1.bf16.msra.mxu0 %v2279_v48  ;;  %1736 = vmatpush1.bf16.msra.mxu1 %v2283_v52 }
 0x1a6   :  { %1706 = vmatprep.subr.bf16.mxu0 %v2285_v53  ;;  %1738 = vmatprep.subr.bf16.mxu1 %v2288_v58 }
 0x1a9   :  { %1708 = vmatpush1.bf16.msra.mxu0 %v2291_v5  ;;  %1740 = vmatpush1.bf16.msra.mxu1 %v2295_v6 }
 0x1aa   :  { %1710 = vmatprep.subr.bf16.mxu0 %v2297_v7  ;;  %1742 = vmatprep.subr.bf16.mxu1 %v2300_v13 }
 0x1ad   :  { %1712 = vmatpush1.bf16.msra.mxu0 %v2303_v17  ;;  %1744 = vmatpush1.bf16.msra.mxu1 %v2307_v18 }
 0x1ae   :  { %1746 = vmatprep.subr.bf16.mxu0 %v2214_v38  ;;  %1778 = vmatprep.subr.bf16.mxu1 %v2216_v42 }
 0x263   :  { %v606_v45 = vpop.f32.mrb[4].mxu0  ;;  %v677_v46 = vpop.f32.mrb[4].mxu1 }
 0x264   :  { %v686_v47 = vrot.slane %v606_v45, 7  ;;  %v608_v54 = vpop.f32.mrb[5].mxu0  ;;  %v679_v56 = vpop.f32.mrb[5].mxu1  ;;  %v688_v15 = vrot.slane %v677_v46, 7 }
 0x265   :  { %v687_v57 = vrot.slane %v608_v54, 7  ;;  %v689_v9 = vrot.slane %v679_v56, 7 }
 0x266   :  { %v694_v59 = vadd.f32 %v686_v47, %v2353_v39  ;;  %v696_v20 = vadd.f32 %v688_v15, %v2362_v8 }
 0x267   :  { %v695_v60 = vadd.f32 %v687_v57, %v2355_v40  ;;  %v697_v14 = vadd.f32 %v689_v9, %v2359_v1 }
 0x268   :  { %v1424_v2 = vmul.f32 -1.442695, %v694_v59 }
 0x269   :  { %v1425_v3 = vmul.f32 -1.442695, %v695_v60  ;;  %v1426_v19 = vmul.f32 -1.442695, %v697_v14 }
 0x26a   :  { %1925 = vpow2.f32 %v1424_v2 }
 0x26b   :  { %1927 = vpow2.f32 %v1425_v3 }
 0x26c   :  { %1929 = vpow2.f32 %v1426_v19 }
 0x26d   :  { %1931 = vtanh.f32 %v696_v20 }
 0x274   :  { %v1926_v26 = vpop.eup %1925 }
 0x275   :  { %v1928_v27 = vpop.eup %1927  ;;  %v701_v25 = vadd.f32 1.0, %v1926_v26 }
 0x276   :  { %v707_v29 = vadd.f32 1.0, %v1928_v27  ;;  %v1930_v31 = vpop.eup %1929 }
 0x277   :  { %1933 = vrcp.f32 %v701_v25  ;;  %v1932_v30 = vpop.eup %1931  ;;  %v714_v45 = vadd.f32 1.0, %v1930_v31 }
 0x278   :  { %1935 = vrcp.f32 %v707_v29 }
 0x279   :  { %1937 = vrcp.f32 %v714_v45 }
 0x281   :  { %v1934_v32 = vpop.eup %1933 }
 0x282   :  { %v1936_v37 = vpop.eup %1935  ;;  %v721_v43 = vmul.f32 %v1934_v32, %v1932_v30 }
 0x283   :  { %v720_v46 = vmul.f32 %v1936_v37, %v718_v33  ;;  %v1938_v54 = vpop.eup %1937 }
 0x285   :  { %v2411_v47 = vadd.f32 %v721_v43, %v720_v46 }
 0x287   :  { %1939 = vtanh.f32 %v2411_v47  ;;  %v906_v46 = vrot.slane %v2411_v47, 7 }
 0x291   :  { %v1940_v56 = vpop.eup %1939 }
 0x292   :  { %v2414_v57 = vmul.f32 %v1940_v56, %v1938_v54 }
 0x294   :  { %v726_v59 = vrot.slane %v2414_v57, 1 }
 0x296   :  { %793 = vmatmul.mubr.f32.vlgmr.msra.gmra.mrb[6].mxu0 %v726_v59  ;;  %864 = vmatmul.mubr.f32.vlgmr.msra.gmra.mrb[6].mxu1 %v726_v59 }
 0x297   :  { %1748 = vmatpush1.bf16.msra.mxu0 %v2218_v49  ;;  %1780 = vmatpush1.bf16.msra.mxu1 %v2221_v50 }
 0x298   :  { %1750 = vmatprep.subr.bf16.mxu0 %v2223_v51  ;;  %1782 = vmatprep.subr.bf16.mxu1 %v2226_v55 }
 0x299   :  { %980 = vmatprep.mubr.f32.mxu0 %v2119_v0  ;;  %1051 = vmatprep.mubr.f32.mxu1 %v2119_v0 }
 0x29b   :  { %1752 = vmatpush1.bf16.msra.mxu0 %v2229_v61  ;;  %1784 = vmatpush1.bf16.msra.mxu1 %v2233_v62 }
 0x29c   :  { %1754 = vmatprep.subr.bf16.mxu0 %v2235_v63  ;;  %1786 = vmatprep.subr.bf16.mxu1 %v2238_v4 }
 0x29f   :  { %1756 = vmatpush1.bf16.msra.mxu0 %v2243_v10  ;;  %1788 = vmatpush1.bf16.msra.mxu1 %v2247_v11 }
 0x2a0   :  { %1758 = vmatprep.subr.bf16.mxu0 %v2249_v12  ;;  %1790 = vmatprep.subr.bf16.mxu1 %v2252_v16 }
 0x2a3   :  { %1760 = vmatpush1.bf16.msra.mxu0 %v2255_v22  ;;  %1792 = vmatpush1.bf16.msra.mxu1 %v2259_v23 }
 0x2a4   :  { %1762 = vmatprep.subr.bf16.mxu0 %v2261_v24  ;;  %1794 = vmatprep.subr.bf16.mxu1 %v2264_v28 }
 0x2a7   :  { %1764 = vmatpush1.bf16.msra.mxu0 %v2267_v34  ;;  %1796 = vmatpush1.bf16.msra.mxu1 %v2271_v35 }
 0x2a8   :  { %1766 = vmatprep.subr.bf16.mxu0 %v2273_v36  ;;  %1798 = vmatprep.subr.bf16.mxu1 %v2276_v41 }
 0x2ab   :  { %1768 = vmatpush1.bf16.msra.mxu0 %v2279_v48  ;;  %1800 = vmatpush1.bf16.msra.mxu1 %v2283_v52 }
 0x2ac   :  { %1770 = vmatprep.subr.bf16.mxu0 %v2285_v53  ;;  %1802 = vmatprep.subr.bf16.mxu1 %v2288_v58 }
 0x2af   :  { %1772 = vmatpush1.bf16.msra.mxu0 %v2291_v5  ;;  %1804 = vmatpush1.bf16.msra.mxu1 %v2295_v6 }
 0x2b0   :  { %1774 = vmatprep.subr.bf16.mxu0 %v2297_v7  ;;  %1806 = vmatprep.subr.bf16.mxu1 %v2300_v13 }
 0x2b3   :  { %1776 = vmatpush1.bf16.msra.mxu0 %v2303_v17  ;;  %1808 = vmatpush1.bf16.msra.mxu1 %v2307_v18 }
 0x2b4   :  { %1810 = vmatprep.subr.bf16.mxu0 %v2214_v38  ;;  %1842 = vmatprep.subr.bf16.mxu1 %v2216_v42 }
 0x369   :  { %v794_v21 = vpop.f32.mrb[6].mxu0  ;;  %v865_v60 = vpop.f32.mrb[6].mxu1 }
 0x36a   :  { %v874_v2 = vrot.slane %v794_v21, 6  ;;  %v796_v3 = vpop.f32.mrb[7].mxu0  ;;  %v867_v9 = vpop.f32.mrb[7].mxu1  ;;  %v876_v38 = vrot.slane %v865_v60, 6 }
 0x36b   :  { %v875_v14 = vrot.slane %v796_v3, 6  ;;  %v877_v27 = vrot.slane %v867_v9, 6 }
 0x36c   :  { %v882_v15 = vadd.f32 %v874_v2, %v2353_v39  ;;  %v884_v42 = vadd.f32 %v876_v38, %v2362_v8  ;;  %v1299_v38 = vld [vmem:[#allocation8 + $0x10] sm:$0xff] }
 0x36d   :  { %v883_v19 = vadd.f32 %v875_v14, %v2355_v40  ;;  %v885_v25 = vadd.f32 %v877_v27, %v2359_v1  ;;  %v1290_v14 = vsel %vm1289_vm0, %v2368_v44, %v2414_v57 }
 0x36e   :  { %v1427_v20 = vmul.f32 -1.442695, %v882_v15 }
 0x36f   :  { %v1428_v26 = vmul.f32 -1.442695, %v883_v19  ;;  %v1429_v29 = vmul.f32 -1.442695, %v885_v25  ;;  %v2120_v25 = vmov 0.0|0.0  }
 0x370   :  { %1941 = vpow2.f32 %v1427_v20  ;;  %v1297_v20 = vld [vmem:[#allocation8] sm:$0xff] }
 0x371   :  { %1943 = vpow2.f32 %v1428_v26  ;;  %v1298_v26 = vld [vmem:[#allocation8 + $0x8] sm:$0xff] }
 0x372   :  { %1945 = vpow2.f32 %v1429_v29  ;;  %v1874_v27 = vpack.c.bf16 %v1298_v26, %v1297_v20  ;;  %v1300_v29 = vld [vmem:[#allocation8 + $0x18] sm:$0xff] }
 0x373   :  { %1947 = vtanh.f32 %v884_v42  ;;  %v1877_v42 = vpack.c.bf16 %v1300_v29, %v1299_v38 }
 0x37a   :  { %v1942_v31 = vpop.eup %1941 }
 0x37b   :  { %v1944_v30 = vpop.eup %1943  ;;  %v889_v32 = vadd.f32 1.0, %v1942_v31  ;;  %v1301_v31 = vld [vmem:[#allocation8 + $0x20] sm:$0xff] }
 0x37c   :  { %v895_v33 = vadd.f32 1.0, %v1944_v30  ;;  %v1946_v37 = vpop.eup %1945  ;;  %v1302_v30 = vld [vmem:[#allocation8 + $0x28] sm:$0xff] }
 0x37d   :  { %1949 = vrcp.f32 %v889_v32  ;;  %v1948_v43 = vpop.eup %1947  ;;  %v902_v59 = vadd.f32 1.0, %v1946_v37  ;;  %v1880_v32 = vpack.c.bf16 %v1302_v30, %v1301_v31  ;;  %v1304_v37 = vld [vmem:[#allocation8 + $0x38] sm:$0xff] }
 0x37e   :  { %1951 = vrcp.f32 %v895_v33  ;;  %v1303_v33 = vld [vmem:[#allocation8 + $0x30] sm:$0xff] }
 0x37f   :  { %1953 = vrcp.f32 %v902_v59  ;;  %v1308_v59 = vld [vmem:[#allocation8 + $0x58] sm:$0xff] }
 0x387   :  { %v1950_v45 = vpop.eup %1949 }
 0x388   :  { %v1952_v54 = vpop.eup %1951  ;;  %v909_v56 = vmul.f32 %v1950_v45, %v1948_v43  ;;  %v1883_v43 = vpack.c.bf16 %v1304_v37, %v1303_v33  ;;  %v1305_v45 = vld [vmem:[#allocation8 + $0x40] sm:$0xff] }
 0x389   :  { %v908_v21 = vmul.f32 %v1952_v54, %v906_v46  ;;  %v1954_v2 = vpop.eup %1953  ;;  %v1306_v46 = vld [vmem:[#allocation8 + $0x48] sm:$0xff] }
 0x38a   :  { %v1886_v54 = vpack.c.bf16 %v1306_v46, %v1305_v45 }
 0x38b   :  { %v2456_v60 = vadd.f32 %v909_v56, %v908_v21  ;;  %v1307_v56 = vld [vmem:[#allocation8 + $0x50] sm:$0xff] }
 0x38c   :  { %v1889_v21 = vpack.c.bf16 %v1308_v59, %v1307_v56 }
 0x38d   :  { %1955 = vtanh.f32 %v2456_v60 }
 0x397   :  { %v1956_v3 = vpop.eup %1955 }
 0x398   :  { %v912_v9 = vmul.f32 %v1956_v3, %v1954_v2  ;;  %v1310_v2 = vld [vmem:[#allocation8 + $0x68] sm:$0xff] }
 0x39a   :  { %v914_v15 = vrot.slane %v912_v9, 2  ;;  %v2461_v19 = vsel %vm1291_vm1, %v1290_v14, %v912_v9  ;;  %v1311_v9 = vld [vmem:[#allocation8 + $0x70] sm:$0xff]  ;;  %v1312_v14 = vld [vmem:[#allocation8 + $0x78] sm:$0xff] }
 0x39c   :  { %981 = vmatmul.mubr.f32.vlgmr.msra.gmra.mrb[8].mxu0 %v914_v15  ;;  %1052 = vmatmul.mubr.f32.vlgmr.msra.gmra.mrb[8].mxu1 %v914_v15  ;;  %v1895_v15 = vpack.c.bf16 %v1312_v14, %v1311_v9 }
 0x39d   :  { %1812 = vmatpush1.bf16.msra.mxu0 %v2218_v49  ;;  %1844 = vmatpush1.bf16.msra.mxu1 %v2221_v50 }
 0x39e   :  { %1814 = vmatprep.subr.bf16.mxu0 %v2223_v51  ;;  %1846 = vmatprep.subr.bf16.mxu1 %v2226_v55 }
 0x39f   :  { %1168 = vmatprep.mubr.f32.mxu0 %v2119_v0  ;;  %1239 = vmatprep.mubr.f32.mxu1 %v2119_v0 }
 0x3a1   :  { %1816 = vmatpush1.bf16.msra.mxu0 %v2229_v61  ;;  %1848 = vmatpush1.bf16.msra.mxu1 %v2233_v62 }
 0x3a2   :  { %1818 = vmatprep.subr.bf16.mxu0 %v2235_v63  ;;  %1850 = vmatprep.subr.bf16.mxu1 %v2238_v4 }
 0x3a5   :  { %1820 = vmatpush1.bf16.msra.mxu0 %v2243_v10  ;;  %1852 = vmatpush1.bf16.msra.mxu1 %v2247_v11 }
 0x3a6   :  { %1822 = vmatprep.subr.bf16.mxu0 %v2249_v12  ;;  %1854 = vmatprep.subr.bf16.mxu1 %v2252_v16 }
 0x3a9   :  { %1824 = vmatpush1.bf16.msra.mxu0 %v2255_v22  ;;  %1856 = vmatpush1.bf16.msra.mxu1 %v2259_v23 }
 0x3aa   :  { %1826 = vmatprep.subr.bf16.mxu0 %v2261_v24  ;;  %1858 = vmatprep.subr.bf16.mxu1 %v2264_v28 }
 0x3ad   :  { %1828 = vmatpush1.bf16.msra.mxu0 %v2267_v34  ;;  %1860 = vmatpush1.bf16.msra.mxu1 %v2271_v35 }
 0x3ae   :  { %1830 = vmatprep.subr.bf16.mxu0 %v2273_v36  ;;  %1862 = vmatprep.subr.bf16.mxu1 %v2276_v41 }
 0x3b1   :  { %1832 = vmatpush1.bf16.msra.mxu0 %v2279_v48  ;;  %1864 = vmatpush1.bf16.msra.mxu1 %v2283_v52 }
 0x3b2   :  { %1834 = vmatprep.subr.bf16.mxu0 %v2285_v53  ;;  %1866 = vmatprep.subr.bf16.mxu1 %v2288_v58  ;;  %v1094_v53 = vrot.slane %v2456_v60, 7  ;;  %v1309_v60 = vld [vmem:[#allocation8 + $0x60] sm:$0xff] }
 0x3b3   :  { %v1892_v3 = vpack.c.bf16 %v1310_v2, %v1309_v60 }
 0x3b5   :  { %1836 = vmatpush1.bf16.msra.mxu0 %v2291_v5  ;;  %1868 = vmatpush1.bf16.msra.mxu1 %v2295_v6 }
 0x3b6   :  { %1838 = vmatprep.subr.bf16.mxu0 %v2297_v7  ;;  %1870 = vmatprep.subr.bf16.mxu1 %v2300_v13 }
 0x3b9   :  { %1840 = vmatpush1.bf16.msra.mxu0 %v2303_v17  ;;  %1872 = vmatpush1.bf16.msra.mxu1 %v2307_v18 }
 0x3ba   :  { %1873 = vmatprep.subr.bf16.mxu0 %v2120_v25 }
 0x46f   :  { %v982_v49 = vpop.f32.mrb[8].mxu0  ;;  %v1053_v50 = vpop.f32.mrb[8].mxu1 }
 0x470   :  { %v1062_v51 = vrot.slane %v982_v49, 5  ;;  %v984_v55 = vpop.f32.mrb[9].mxu0  ;;  %v1055_v61 = vpop.f32.mrb[9].mxu1  ;;  %v1064_v22 = vrot.slane %v1053_v50, 5 }
 0x471   :  { %v1063_v62 = vrot.slane %v984_v55, 5  ;;  %v1065_v12 = vrot.slane %v1055_v61, 5 }
 0x472   :  { %v1070_v63 = vadd.f32 %v1062_v51, %v2353_v39  ;;  %v1072_v24 = vadd.f32 %v1064_v22, %v2362_v8 }
 0x473   :  { %v1071_v4 = vadd.f32 %v1063_v62, %v2355_v40  ;;  %v1073_v16 = vadd.f32 %v1065_v12, %v2359_v1 }
 0x474   :  { %v1430_v10 = vmul.f32 -1.442695, %v1070_v63 }
 0x475   :  { %v1431_v11 = vmul.f32 -1.442695, %v1071_v4  ;;  %v1432_v23 = vmul.f32 -1.442695, %v1073_v16 }
 0x476   :  { %1957 = vpow2.f32 %v1430_v10 }
 0x477   :  { %1959 = vpow2.f32 %v1431_v11 }
 0x478   :  { %1961 = vpow2.f32 %v1432_v23 }
 0x479   :  { %1963 = vtanh.f32 %v1072_v24 }
 0x480   :  { %v1958_v28 = vpop.eup %1957 }
 0x481   :  { %v1960_v34 = vpop.eup %1959  ;;  %v1077_v35 = vadd.f32 1.0, %v1958_v28 }
 0x482   :  { %v1083_v36 = vadd.f32 1.0, %v1960_v34  ;;  %v1962_v41 = vpop.eup %1961 }
 0x483   :  { %1965 = vrcp.f32 %v1077_v35  ;;  %v1964_v48 = vpop.eup %1963  ;;  %v1090_v6 = vadd.f32 1.0, %v1962_v41 }
 0x484   :  { %1967 = vrcp.f32 %v1083_v36 }
 0x485   :  { %1969 = vrcp.f32 %v1090_v6 }
 0x48d   :  { %v1966_v52 = vpop.eup %1965 }
 0x48e   :  { %v1968_v58 = vpop.eup %1967  ;;  %v1097_v5 = vmul.f32 %v1966_v52, %v1964_v48 }
 0x48f   :  { %v1096_v7 = vmul.f32 %v1968_v58, %v1094_v53  ;;  %v1970_v17 = vpop.eup %1969 }
 0x491   :  { %v2500_v13 = vadd.f32 %v1097_v5, %v1096_v7  ;;  %v1436_v7 = vld [vmem:[%s2533_s5] ss:$0 sm:$0xff]  ;;  %s2081_s5 = scalar_lea.vmem %s1411_s24, 128 }
 0x492   :  { %p2082_p4 = scmp.ne.s32.totalorder %s1411_s24, %s2081_s5  ;;  %p2087_p6 = scmp.lt.s32.totalorder %s2081_s5, %s2081_s5 }
 0x493   :  { %1971 = vtanh.f32 %v2500_v13  ;;  %v1282_v36 = vrot.slane %v2500_v13, 7 }
 0x494   :  { %p2088_p7 = por %p2087_p6, %p2086_p5 }
 0x496   :  { %p2089_p8 = pnand %p2088_p7, %p2082_p4 }
 0x49d   :  { %v1972_v18 = vpop.eup %1971 }
 0x49e   :  { %v1100_v44 = vmul.f32 %v1972_v18, %v1970_v17 }
 0x4a0   :  { %v1102_v47 = vrot.slane %v1100_v44, 3  ;;  %v2504_v57 = vsel %vm1293_vm2, %v2461_v19, %v1100_v44 }
 0x4a2   :  { %1169 = vmatmul.mubr.f32.vlgmr.msra.gmra.mrb[10].mxu0 %v1102_v47  ;;  %1240 = vmatmul.mubr.f32.vlgmr.msra.gmra.mrb[10].mxu1 %v1102_v47 }
 0x4a3   :  { %1875 = vmatpush3.bf16.msra.mxu0 %v1874_v27  ;;  %1486 = vmatprep.mubr.msk.f32.mxu0 %vm2121_vm3, %v2119_v0 }
 0x4a4   :  { %1876 = vmatprep.subr.bf16.mxu0 %v2120_v25 }
 0x4a7   :  { %1878 = vmatpush3.bf16.msra.mxu0 %v1877_v42 }
 0x4a8   :  { %1879 = vmatprep.subr.bf16.mxu0 %v2120_v25 }
 0x4ab   :  { %1881 = vmatpush3.bf16.msra.mxu0 %v1880_v32 }
 0x4ac   :  { %1882 = vmatprep.subr.bf16.mxu0 %v2120_v25 }
 0x4af   :  { %1884 = vmatpush3.bf16.msra.mxu0 %v1883_v43 }
 0x4b0   :  { %1885 = vmatprep.subr.bf16.mxu0 %v2120_v25 }
 0x4b3   :  { %1887 = vmatpush3.bf16.msra.mxu0 %v1886_v54 }
 0x4b4   :  { %1888 = vmatprep.subr.bf16.mxu0 %v2120_v25 }
 0x4b7   :  { %1890 = vmatpush3.bf16.msra.mxu0 %v1889_v21 }
 0x4b8   :  { %1891 = vmatprep.subr.bf16.mxu0 %v2120_v25 }
 0x4bb   :  { %1893 = vmatpush3.bf16.msra.mxu0 %v1892_v3 }
 0x4bc   :  { %1894 = vmatprep.subr.bf16.mxu0 %v2120_v25 }
 0x4bf   :  { %1896 = vmatpush3.bf16.msra.mxu0 %v1895_v15 }
 0x575   :  { %v1170_v19 = vpop.f32.mrb[10].mxu0  ;;  %v1241_v49 = vpop.f32.mrb[10].mxu1 }
 0x576   :  { %v1250_v50 = vrot.slane %v1170_v19, 4  ;;  %v1172_v51 = vpop.f32.mrb[11].mxu0  ;;  %v1243_v55 = vpop.f32.mrb[11].mxu1  ;;  %v1252_v12 = vrot.slane %v1241_v49, 4 }
 0x577   :  { %v1251_v0 = vrot.slane %v1172_v51, 4  ;;  %v1253_v10 = vrot.slane %v1243_v55, 4 }
 0x578   :  { %v1258_v61 = vadd.f32 %v1250_v50, %v2353_v39  ;;  %v1260_v22 = vadd.f32 %v1252_v12, %v2362_v8 }
 0x579   :  { %v1259_v62 = vadd.f32 %v1251_v0, %v2355_v40  ;;  %v1261_v11 = vadd.f32 %v1253_v10, %v2359_v1 }
 0x57a   :  { %v1433_v63 = vmul.f32 -1.442695, %v1258_v61 }
 0x57b   :  { %v1434_v4 = vmul.f32 -1.442695, %v1259_v62  ;;  %v1435_v16 = vmul.f32 -1.442695, %v1261_v11 }
 0x57c   :  { %1973 = vpow2.f32 %v1433_v63 }
 0x57d   :  { %1975 = vpow2.f32 %v1434_v4 }
 0x57e   :  { %1977 = vpow2.f32 %v1435_v16 }
 0x57f   :  { %1979 = vtanh.f32 %v1260_v22 }
 0x586   :  { %v1974_v23 = vpop.eup %1973 }
 0x587   :  { %v1976_v24 = vpop.eup %1975  ;;  %v1265_v28 = vadd.f32 1.0, %v1974_v23 }
 0x588   :  { %v1271_v34 = vadd.f32 1.0, %v1976_v24  ;;  %v1978_v39 = vpop.eup %1977 }
 0x589   :  { %1981 = vrcp.f32 %v1265_v28  ;;  %v1980_v40 = vpop.eup %1979  ;;  %v1278_v1 = vadd.f32 1.0, %v1978_v39 }
 0x58a   :  { %1983 = vrcp.f32 %v1271_v34 }
 0x58b   :  { %1985 = vrcp.f32 %v1278_v1 }
 0x593   :  { %v1982_v35 = vpop.eup %1981 }
 0x594   :  { %v1984_v41 = vpop.eup %1983  ;;  %v1285_v48 = vmul.f32 %v1982_v35, %v1980_v40 }
 0x595   :  { %v1284_v52 = vmul.f32 %v1984_v41, %v1282_v36  ;;  %v1986_v8 = vpop.eup %1985 }
 0x597   :  { %v1286_v53 = vadd.f32 %v1285_v48, %v1284_v52 }
 0x599   :  { %1987 = vtanh.f32 %v1286_v53 }
 0x5a3   :  { %v1988_v58 = vpop.eup %1987 }
 0x5a4   :  { %v1288_v5 = vmul.f32 %v1988_v58, %v1986_v8 }
 0x5a6   :  { %v1296_v6 = vsel %vm1295_vm4, %v2504_v57, %v1288_v5 }
 0x5a7   :  { %1487 = vmatmul.mubr.f32.vlgmr.msra.gmra.mrb[12].mxu0 %v1296_v6 }
 0x67a   :  { %v1386_v17 = vpop.f32.mrb[12].mxu0 }
 0x67b   :  { %v1387_v13 = vadd.f32 %v1436_v7, %v1386_v17  ;;  %v1488_v18 = vpop.f32.mrb[13].mxu0 }
 0x67d   :  { %v1391_v44 = vsel %vm1390_vm5, %v1387_v13, -inf }
 0x67e   :  { %1392 = vmax.xlane.f32.xlu0 %v1391_v44 }
 0x70b   :  { %v1393_v47 = vpop.xlane.xlu0 %1392 }
 0x70c   :  { %v1394_v20 = vsub.f32 %v1387_v13, %v1393_v47 }
 0x70e   :  { %v1395_v26 = vmul.f32 1.442695, %v1394_v20 }
 0x710   :  { %1989 = vpow2.f32 %v1395_v26 }
 0x71a   :  { %v1990_v27 = vpop.eup %1989 }
 0x71b   :  { %v1397_v25 = vsel %vm1390_vm5, %v1990_v27, 0.0 }
 0x71c   :  { %1398 = vadd.xlane.f32.xlu0 %v1397_v25 }
 0x7a9   :  { %v1399_v38 = vpop.xlane.xlu0 %1398 }
 0x7aa   :  { %1991 = vlog2.f32 %v1399_v38 }
 0x7b4   :  { %v1992_v57 = vpop.eup %1991 }
 0x7b5   :  { %v1401_v29 = vmul.f32 0.6931472, %v1992_v57 }
 0x7b7   :  { %v1402_v42 = vsub.f32 %v1394_v20, %v1401_v29 }
 0x7b9   :  { %1403 = vst [vmem:[#allocation10] sm:$0x1f] %v1402_v42 }
 0x7ba   :  { %2092 = shalt.err (!%p2089_p8)
}
 0x7bb   :  { %s2093_s27 = scalar_lea.hbm %s2534_s6, 128 }
 0x7bc   :  { %p2094_p9 = scmp.ne.s32.totalorder %s2534_s6, %s2093_s27  ;;  %p2097_p10 = scmp.lt.u32.totalorder %s2093_s27, %s2534_s6 }
 0x7be   :  { %p2099_p11 = pnand %p2097_p10, %p2094_p9 }
 0x7c0   :  { %2102 = shalt.err (!%p2099_p11)
}
 0x7c1   :  { %1413 = dma.vmem_to_hbm [thread:$0]  %s1411_s24, 128, %s2534_s6, [#allocation4]  }
 0x7c2   :  { %2109 = dma.done.wait [#allocation4], 128  }
 0x7c3   :  { %2110 = vsyncadd [#allocation4], 4294967168 }
 0x7c4   :  { %1417 = vsyncpa [#allocation3], 1 }
 0x7c5   :  { %1418 = vsyncpa [#allocation6], 1 }
 0x7c6   :  { %1419 = vsyncpa [#allocation9], 1 }
 0x7c7   :  { %1420 = vsyncpa [#allocation4], 1 }

</bundles_post_ra>
